<compile_context>
chip_gen: v7x
topology: tpu7x:2x2x1
jax: 0.10.0
libtpu: 0.0.40
codegen_flags: <defaults>
</compile_context>

<pallas_src>
import jax
import jax.numpy as jnp
import numpy as np
from jax.experimental import pallas as pl
from jax.experimental.pallas import tpu as pltpu


def decoder_pallas(x1_nchw, x2_nchw, w_up, b_up, w_c, b_c):
    N, Cin, H, W = x1_nchw.shape
    Cout = w_up.shape[1]
    Cm = w_c.shape[1]
    Cs = Cm - Cout
    Ho, Wo = 2 * H, 2 * W
    HW, HoWo = H * W, Ho * Wo
    ext = Wo + 1              # zero margin so every 3x3 tap is a plain lane slice
    f32 = jnp.float32

    # ---- inputs: NCHW kept as-is, only free contiguous reshapes (no transposes) ----
    x1f = x1_nchw.reshape(N, Cin, HW).astype(f32)
    x2f = x2_nchw.reshape(N, Cs, HoWo).astype(f32)

    # ---- weight repacking (weights only, tiny) ----
    # transposed-conv taps, rows ordered (ki*2+kj)*Cout + o
    wup_all = jnp.transpose(w_up, (2, 3, 1, 0)).reshape(4 * Cout, Cin).astype(f32)
    # 3x3 conv as one (Cout, 9*Cm) matrix, columns ordered (r*3+s)*Cm + c
    wc9 = jnp.transpose(w_c, (0, 2, 3, 1)).reshape(Cout, 9 * Cm).astype(f32)
    bup2 = b_up.reshape(Cout, 1).astype(f32)
    bc2 = b_c.reshape(Cout, 1).astype(f32)

    # ---- constant 0/1 scatter matrices: tap (ki,kj) at (i,j) -> flat (2i+ki, 2j+kj) ----
    ii = jnp.arange(H)[:, None]
    jj = jnp.arange(W)[None, :]
    m_idx = (ii * W + jj).reshape(-1)
    g_list = []
    for ki in range(2):
        for kj in range(2):
            n_idx = ((2 * ii + ki) * Wo + (2 * jj + kj)).reshape(-1)
            g_list.append(jnp.zeros((HW, HoWo), f32).at[m_idx, n_idx].set(1.0))
    G = jnp.stack(g_list)                                    # (4, HW, HoWo)

    # ---- boundary masks of the 9 conv taps on the flattened spatial axis ----
    yy = jnp.arange(Ho)[:, None]
    xx = jnp.arange(Wo)[None, :]
    m_list = []
    for r in range(3):
        for s in range(3):
            ok = ((yy + r - 1 >= 0) & (yy + r - 1 < Ho) &
                  (xx + s - 1 >= 0) & (xx + s - 1 < Wo))
            m_list.append(ok.reshape(-1))
    msk = jnp.stack(m_list).astype(f32)                      # (9, HoWo)

    def kernel(x1_ref, x2_ref, wup_ref, bup_ref, wc_ref, bc_ref, g_ref, msk_ref,
               o_ref, x2e_ref, upe_ref, t_ref):
        # ---- transposed conv: ONE fat matmul for all 4 stride-2 taps ----
        u = jnp.dot(wup_ref[...], x1_ref[0],
                    preferred_element_type=jnp.float32)          # (4*Cout, HW)
        # interleave the taps to full resolution on the MXU (exact 0/1 scatter)
        up = jnp.dot(u[0:Cout, :], g_ref[0], preferred_element_type=jnp.float32)
        for t in range(1, 4):
            up = up + jnp.dot(u[t * Cout:(t + 1) * Cout, :], g_ref[t],
                              preferred_element_type=jnp.float32)
        up = up + bup_ref[...]                                   # (Cout, HoWo), bias hoisted

        # ---- zero-extended flat buffers: 3x3 taps become plain lane slices ----
        zpad_up = jnp.zeros((Cout, ext), jnp.float32)
        zpad_x2 = jnp.zeros((Cs, ext), jnp.float32)
        upe_ref[:, 0:ext] = zpad_up
        upe_ref[:, ext + HoWo:ext + HoWo + ext] = zpad_up
        upe_ref[:, ext:ext + HoWo] = up
        x2e_ref[:, 0:ext] = zpad_x2
        x2e_ref[:, ext + HoWo:ext + HoWo + ext] = zpad_x2
        x2e_ref[:, ext:ext + HoWo] = x2_ref[0]

        # ---- im2col-lite (concat expressed as split channel blocks), built once in VMEM ----
        for r in range(3):
            for s in range(3):
                ti = r * 3 + s
                start = ext + (r - 1) * Wo + (s - 1)
                m = msk_ref[ti:ti + 1, :]                        # (1, HoWo) border mask
                t_ref[ti * Cm:ti * Cm + Cout, :] = upe_ref[:, start:start + HoWo] * m
                t_ref[ti * Cm + Cout:(ti + 1) * Cm, :] = x2e_ref[:, start:start + HoWo] * m

        # ---- one K = 9*Cm conv matmul + bias + LeakyReLU, lane-dense store ----
        acc = jnp.dot(wc_ref[...], t_ref[...], preferred_element_type=jnp.float32)
        acc = acc + bc_ref[...]
        o_ref[0] = jnp.where(acc > 0, acc, 0.01 * acc)

    out_flat = pl.pallas_call(
        kernel,
        out_shape=jax.ShapeDtypeStruct((N, Cout, HoWo), f32),
        grid=(N,),
        in_specs=[
            pl.BlockSpec((1, Cin, HW), lambda n: (n, 0, 0)),
            pl.BlockSpec((1, Cs, HoWo), lambda n: (n, 0, 0)),
            pl.BlockSpec((4 * Cout, Cin), lambda n: (0, 0)),
            pl.BlockSpec((Cout, 1), lambda n: (0, 0)),
            pl.BlockSpec((Cout, 9 * Cm), lambda n: (0, 0)),
            pl.BlockSpec((Cout, 1), lambda n: (0, 0)),
            pl.BlockSpec((4, HW, HoWo), lambda n: (0, 0, 0)),
            pl.BlockSpec((9, HoWo), lambda n: (0, 0)),
        ],
        out_specs=pl.BlockSpec((1, Cout, HoWo), lambda n: (n, 0, 0)),
        scratch_shapes=[
            pltpu.VMEM((Cs, HoWo + 2 * ext), f32),    # zero-extended flat x2
            pltpu.VMEM((Cout, HoWo + 2 * ext), f32),  # zero-extended flat upsample
            pltpu.VMEM((9 * Cm, HoWo), f32),          # im2col buffer
        ],
        compiler_params=pltpu.CompilerParams(dimension_semantics=("parallel",)),
    )(x1f, x2f, wup_all, bup2, wc9, bc2, G, msk)

    # free contiguous reshape back to NCHW (no transpose pass)
    return out_flat.reshape(N, Cout, Ho, Wo)


def decoder_ref(x1, x2, w_up, b_up, w_c, b_c):
    # pure-JAX reference mirroring PyTorch semantics (NCHW)
    N, Cin, H, W = x1.shape
    Cout = w_up.shape[1]
    up = jnp.einsum('nihw,iokl->nohkwl', x1, w_up).reshape(N, Cout, 2 * H, 2 * W)
    up = up + b_up[None, :, None, None]
    cat = jnp.concatenate([up, x2], axis=1)
    pad = jnp.pad(cat, ((0, 0), (0, 0), (1, 1), (1, 1)))
    Ho, Wo = 2 * H, 2 * W
    out = jnp.zeros((N, w_c.shape[0], Ho, Wo), jnp.float32)
    for di in range(3):
        for dj in range(3):
            out = out + jnp.einsum('nchw,oc->nohw',
                                   pad[:, :, di:di + Ho, dj:dj + Wo], w_c[:, :, di, dj])
    out = out + b_c[None, :, None, None]
    return jnp.where(out > 0, out, 0.01 * out)  # LeakyReLU, default slope 0.01


if __name__ == "__main__":
    key = jax.random.PRNGKey(0)
    in_channels, out_channels = 4, 4
    middle_channels = 8                  # = out_channels (up path) + skip channels
    skip_channels = middle_channels - out_channels
    N, H, W = 2, 8, 8                    # x1 spatial; x2 / output spatial is 2H x 2W

    k1, k2, k3, k4, k5, k6 = jax.random.split(key, 6)
    x1 = jax.random.normal(k1, (N, in_channels, H, W), jnp.float32)
    x2 = jax.random.normal(k2, (N, skip_channels, 2 * H, 2 * W), jnp.float32)
    w_up = jax.random.normal(k3, (in_channels, out_channels, 2, 2), jnp.float32) * 0.2
    b_up = jax.random.normal(k4, (out_channels,), jnp.float32) * 0.1
    w_c = jax.random.normal(k5, (out_channels, middle_channels, 3, 3), jnp.float32) * 0.2
    b_c = jax.random.normal(k6, (out_channels,), jnp.float32) * 0.1

    out = jax.jit(decoder_pallas)(x1, x2, w_up, b_up, w_c, b_c)
    out = jax.block_until_ready(out)

    ref = decoder_ref(x1, x2, w_up, b_up, w_c, b_c)
    assert out.shape == ref.shape == (N, out_channels, 2 * H, 2 * W)
    np.testing.assert_allclose(np.asarray(out), np.asarray(ref), rtol=5e-4, atol=5e-4)
    print("KERNEL_OK")
</pallas_src>

<mosaic_0001>
module attributes {stable_mosaic.version = 11 : i64} {
  func.func @kernel(%arg0: i32, %arg1: memref<1x4x64xf32, #tpu.memory_space<vmem>>, %arg2: memref<1x4x256xf32, #tpu.memory_space<vmem>>, %arg3: memref<16x4xf32, #tpu.memory_space<vmem>>, %arg4: memref<4x1xf32, #tpu.memory_space<vmem>>, %arg5: memref<4x72xf32, #tpu.memory_space<vmem>>, %arg6: memref<4x1xf32, #tpu.memory_space<vmem>>, %arg7: memref<4x64x256xf32, #tpu.memory_space<vmem>>, %arg8: memref<9x256xf32, #tpu.memory_space<vmem>>, %arg9: memref<1x4x256xf32, #tpu.memory_space<vmem>>, %arg10: memref<4x290xf32, #tpu.memory_space<vmem>>, %arg11: memref<4x290xf32, #tpu.memory_space<vmem>>, %arg12: memref<72x256xf32, #tpu.memory_space<vmem>>) attributes {dimension_semantics = [#tpu.dimension_semantics<parallel>], iteration_bounds = array<i64: 2>, scalar_prefetch = 0 : i64, scratch_operands = 3 : i64, tpu.core_type = #tpu.core_type<tc>, window_params = [{transform_indices = @transform_0, window_bounds = array<i64: 1, 4, 64>}, {transform_indices = @transform_1, window_bounds = array<i64: 1, 4, 256>}, {pipeline_mode = #tpu.pipeline_mode<synchronous>, transform_indices = @transform_2, window_bounds = array<i64: 16, 4>}, {pipeline_mode = #tpu.pipeline_mode<synchronous>, transform_indices = @transform_3, window_bounds = array<i64: 4, 1>}, {pipeline_mode = #tpu.pipeline_mode<synchronous>, transform_indices = @transform_4, window_bounds = array<i64: 4, 72>}, {pipeline_mode = #tpu.pipeline_mode<synchronous>, transform_indices = @transform_5, window_bounds = array<i64: 4, 1>}, {pipeline_mode = #tpu.pipeline_mode<synchronous>, transform_indices = @transform_6, window_bounds = array<i64: 4, 64, 256>}, {pipeline_mode = #tpu.pipeline_mode<synchronous>, transform_indices = @transform_7, window_bounds = array<i64: 9, 256>}, {transform_indices = @transform_8, window_bounds = array<i64: 1, 4, 256>}]} {
    %c0 = arith.constant 0 : index
    %c0_0 = arith.constant 0 : index
    %0 = vector.load %arg3[%c0, %c0_0] : memref<16x4xf32, #tpu.memory_space<vmem>>, vector<16x4xf32>
    %c0_1 = arith.constant 0 : index
    %c0_2 = arith.constant 0 : index
    %c0_3 = arith.constant 0 : index
    %1 = vector.load %arg1[%c0_1, %c0_2, %c0_3] : memref<1x4x64xf32, #tpu.memory_space<vmem>>, vector<1x4x64xf32>
    %2 = vector.shape_cast %1 : vector<1x4x64xf32> to vector<4x64xf32>
    %cst = arith.constant dense<0.000000e+00> : vector<16x64xf32>
    %3 = tpu.matmul %0, %2, %cst {dimension_numbers = #tpu.dot_dimension_numbers<[1], [0], [0], [1], [0, 0, 1, 1], [], []>} : vector<16x4xf32>, vector<4x64xf32>, vector<16x64xf32> -> vector<16x64xf32>
    %4 = vector.extract_strided_slice %3 {offsets = [0, 0], sizes = [4, 64], strides = [1, 1]} : vector<16x64xf32> to vector<4x64xf32>
    %c0_4 = arith.constant 0 : index
    %c0_5 = arith.constant 0 : index
    %c0_6 = arith.constant 0 : index
    %5 = vector.load %arg7[%c0_4, %c0_5, %c0_6] : memref<4x64x256xf32, #tpu.memory_space<vmem>>, vector<1x64x256xf32>
    %6 = vector.shape_cast %5 : vector<1x64x256xf32> to vector<64x256xf32>
    %cst_7 = arith.constant dense<0.000000e+00> : vector<4x256xf32>
    %7 = tpu.matmul %4, %6, %cst_7 {dimension_numbers = #tpu.dot_dimension_numbers<[1], [0], [0], [1], [0, 0, 1, 1], [], []>} : vector<4x64xf32>, vector<64x256xf32>, vector<4x256xf32> -> vector<4x256xf32>
    %8 = vector.extract_strided_slice %3 {offsets = [4, 0], sizes = [4, 64], strides = [1, 1]} : vector<16x64xf32> to vector<4x64xf32>
    %c1 = arith.constant 1 : index
    %c0_8 = arith.constant 0 : index
    %c0_9 = arith.constant 0 : index
    %9 = vector.load %arg7[%c1, %c0_8, %c0_9] : memref<4x64x256xf32, #tpu.memory_space<vmem>>, vector<1x64x256xf32>
    %10 = vector.shape_cast %9 : vector<1x64x256xf32> to vector<64x256xf32>
    %cst_10 = arith.constant dense<0.000000e+00> : vector<4x256xf32>
    %11 = tpu.matmul %8, %10, %cst_10 {dimension_numbers = #tpu.dot_dimension_numbers<[1], [0], [0], [1], [0, 0, 1, 1], [], []>} : vector<4x64xf32>, vector<64x256xf32>, vector<4x256xf32> -> vector<4x256xf32>
    %12 = arith.addf %7, %11 : vector<4x256xf32>
    %13 = vector.extract_strided_slice %3 {offsets = [8, 0], sizes = [4, 64], strides = [1, 1]} : vector<16x64xf32> to vector<4x64xf32>
    %c2 = arith.constant 2 : index
    %c0_11 = arith.constant 0 : index
    %c0_12 = arith.constant 0 : index
    %14 = vector.load %arg7[%c2, %c0_11, %c0_12] : memref<4x64x256xf32, #tpu.memory_space<vmem>>, vector<1x64x256xf32>
    %15 = vector.shape_cast %14 : vector<1x64x256xf32> to vector<64x256xf32>
    %cst_13 = arith.constant dense<0.000000e+00> : vector<4x256xf32>
    %16 = tpu.matmul %13, %15, %cst_13 {dimension_numbers = #tpu.dot_dimension_numbers<[1], [0], [0], [1], [0, 0, 1, 1], [], []>} : vector<4x64xf32>, vector<64x256xf32>, vector<4x256xf32> -> vector<4x256xf32>
    %17 = arith.addf %12, %16 : vector<4x256xf32>
    %18 = vector.extract_strided_slice %3 {offsets = [12, 0], sizes = [4, 64], strides = [1, 1]} : vector<16x64xf32> to vector<4x64xf32>
    %c3 = arith.constant 3 : index
    %c0_14 = arith.constant 0 : index
    %c0_15 = arith.constant 0 : index
    %19 = vector.load %arg7[%c3, %c0_14, %c0_15] : memref<4x64x256xf32, #tpu.memory_space<vmem>>, vector<1x64x256xf32>
    %20 = vector.shape_cast %19 : vector<1x64x256xf32> to vector<64x256xf32>
    %cst_16 = arith.constant dense<0.000000e+00> : vector<4x256xf32>
    %21 = tpu.matmul %18, %20, %cst_16 {dimension_numbers = #tpu.dot_dimension_numbers<[1], [0], [0], [1], [0, 0, 1, 1], [], []>} : vector<4x64xf32>, vector<64x256xf32>, vector<4x256xf32> -> vector<4x256xf32>
    %22 = arith.addf %17, %21 : vector<4x256xf32>
    %c0_17 = arith.constant 0 : index
    %c0_18 = arith.constant 0 : index
    %23 = vector.load %arg4[%c0_17, %c0_18] : memref<4x1xf32, #tpu.memory_space<vmem>>, vector<4x1xf32>
    %24 = vector.broadcast %23 : vector<4x1xf32> to vector<4x256xf32>
    %25 = arith.addf %22, %24 : vector<4x256xf32>
    %cst_19 = arith.constant 0.000000e+00 : f32
    %26 = vector.broadcast %cst_19 : f32 to vector<4x17xf32>
    %cst_20 = arith.constant 0.000000e+00 : f32
    %27 = vector.broadcast %cst_20 : f32 to vector<4x17xf32>
    %c0_21 = arith.constant 0 : index
    %c0_22 = arith.constant 0 : index
    %28 = vector.load %arg11[%c0_21, %c0_22] : memref<4x290xf32, #tpu.memory_space<vmem>>, vector<4x17xf32>
    tpu.vector_store %arg11[%c0_21, %c0_22], %26 {strides = array<i32>} : memref<4x290xf32, #tpu.memory_space<vmem>>, vector<4x17xf32>,
    %c0_23 = arith.constant 0 : index
    %c273 = arith.constant 273 : index
    %29 = vector.load %arg11[%c0_23, %c273] : memref<4x290xf32, #tpu.memory_space<vmem>>, vector<4x17xf32>
    tpu.vector_store %arg11[%c0_23, %c273], %26 {strides = array<i32>} : memref<4x290xf32, #tpu.memory_space<vmem>>, vector<4x17xf32>,
    %c0_24 = arith.constant 0 : index
    %c17 = arith.constant 17 : index
    %30 = vector.load %arg11[%c0_24, %c17] : memref<4x290xf32, #tpu.memory_space<vmem>>, vector<4x256xf32>
    tpu.vector_store %arg11[%c0_24, %c17], %25 {strides = array<i32>} : memref<4x290xf32, #tpu.memory_space<vmem>>, vector<4x256xf32>,
    %c0_25 = arith.constant 0 : index
    %c0_26 = arith.constant 0 : index
    %31 = vector.load %arg10[%c0_25, %c0_26] : memref<4x290xf32, #tpu.memory_space<vmem>>, vector<4x17xf32>
    tpu.vector_store %arg10[%c0_25, %c0_26], %27 {strides = array<i32>} : memref<4x290xf32, #tpu.memory_space<vmem>>, vector<4x17xf32>,
    %c0_27 = arith.constant 0 : index
    %c273_28 = arith.constant 273 : index
    %32 = vector.load %arg10[%c0_27, %c273_28] : memref<4x290xf32, #tpu.memory_space<vmem>>, vector<4x17xf32>
    tpu.vector_store %arg10[%c0_27, %c273_28], %27 {strides = array<i32>} : memref<4x290xf32, #tpu.memory_space<vmem>>, vector<4x17xf32>,
    %c0_29 = arith.constant 0 : index
    %c0_30 = arith.constant 0 : index
    %c0_31 = arith.constant 0 : index
    %33 = vector.load %arg2[%c0_29, %c0_30, %c0_31] : memref<1x4x256xf32, #tpu.memory_space<vmem>>, vector<1x4x256xf32>
    %34 = vector.shape_cast %33 : vector<1x4x256xf32> to vector<4x256xf32>
    %c0_32 = arith.constant 0 : index
    %c17_33 = arith.constant 17 : index
    %35 = vector.load %arg10[%c0_32, %c17_33] : memref<4x290xf32, #tpu.memory_space<vmem>>, vector<4x256xf32>
    tpu.vector_store %arg10[%c0_32, %c17_33], %34 {strides = array<i32>} : memref<4x290xf32, #tpu.memory_space<vmem>>, vector<4x256xf32>,
    %c0_34 = arith.constant 0 : index
    %c0_35 = arith.constant 0 : index
    %36 = vector.load %arg8[%c0_34, %c0_35] : memref<9x256xf32, #tpu.memory_space<vmem>>, vector<1x256xf32>
    %c0_36 = arith.constant 0 : index
    %c0_37 = arith.constant 0 : index
    %37 = vector.load %arg11[%c0_36, %c0_37] : memref<4x290xf32, #tpu.memory_space<vmem>>, vector<4x256xf32>
    %38 = vector.broadcast %36 : vector<1x256xf32> to vector<4x256xf32>
    %39 = arith.mulf %37, %38 : vector<4x256xf32>
    %c0_38 = arith.constant 0 : index
    %c0_39 = arith.constant 0 : index
    %40 = vector.load %arg12[%c0_38, %c0_39] : memref<72x256xf32, #tpu.memory_space<vmem>>, vector<4x256xf32>
    tpu.vector_store %arg12[%c0_38, %c0_39], %39 {strides = array<i32>} : memref<72x256xf32, #tpu.memory_space<vmem>>, vector<4x256xf32>,
    %c0_40 = arith.constant 0 : index
    %c0_41 = arith.constant 0 : index
    %41 = vector.load %arg10[%c0_40, %c0_41] : memref<4x290xf32, #tpu.memory_space<vmem>>, vector<4x256xf32>
    %42 = vector.broadcast %36 : vector<1x256xf32> to vector<4x256xf32>
    %43 = arith.mulf %41, %42 : vector<4x256xf32>
    %c4 = arith.constant 4 : index
    %c0_42 = arith.constant 0 : index
    %44 = vector.load %arg12[%c4, %c0_42] : memref<72x256xf32, #tpu.memory_space<vmem>>, vector<4x256xf32>
    tpu.vector_store %arg12[%c4, %c0_42], %43 {strides = array<i32>} : memref<72x256xf32, #tpu.memory_space<vmem>>, vector<4x256xf32>,
    %c1_43 = arith.constant 1 : index
    %c0_44 = arith.constant 0 : index
    %45 = vector.load %arg8[%c1_43, %c0_44] : memref<9x256xf32, #tpu.memory_space<vmem>>, vector<1x256xf32>
    %c0_45 = arith.constant 0 : index
    %c1_46 = arith.constant 1 : index
    %46 = vector.load %arg11[%c0_45, %c1_46] : memref<4x290xf32, #tpu.memory_space<vmem>>, vector<4x256xf32>
    %47 = vector.broadcast %45 : vector<1x256xf32> to vector<4x256xf32>
    %48 = arith.mulf %46, %47 : vector<4x256xf32>
    %c8 = arith.constant 8 : index
    %c0_47 = arith.constant 0 : index
    %49 = vector.load %arg12[%c8, %c0_47] : memref<72x256xf32, #tpu.memory_space<vmem>>, vector<4x256xf32>
    tpu.vector_store %arg12[%c8, %c0_47], %48 {strides = array<i32>} : memref<72x256xf32, #tpu.memory_space<vmem>>, vector<4x256xf32>,
    %c0_48 = arith.constant 0 : index
    %c1_49 = arith.constant 1 : index
    %50 = vector.load %arg10[%c0_48, %c1_49] : memref<4x290xf32, #tpu.memory_space<vmem>>, vector<4x256xf32>
    %51 = vector.broadcast %45 : vector<1x256xf32> to vector<4x256xf32>
    %52 = arith.mulf %50, %51 : vector<4x256xf32>
    %c12 = arith.constant 12 : index
    %c0_50 = arith.constant 0 : index
    %53 = vector.load %arg12[%c12, %c0_50] : memref<72x256xf32, #tpu.memory_space<vmem>>, vector<4x256xf32>
    tpu.vector_store %arg12[%c12, %c0_50], %52 {strides = array<i32>} : memref<72x256xf32, #tpu.memory_space<vmem>>, vector<4x256xf32>,
    %c2_51 = arith.constant 2 : index
    %c0_52 = arith.constant 0 : index
    %54 = vector.load %arg8[%c2_51, %c0_52] : memref<9x256xf32, #tpu.memory_space<vmem>>, vector<1x256xf32>
    %c0_53 = arith.constant 0 : index
    %c2_54 = arith.constant 2 : index
    %55 = vector.load %arg11[%c0_53, %c2_54] : memref<4x290xf32, #tpu.memory_space<vmem>>, vector<4x256xf32>
    %56 = vector.broadcast %54 : vector<1x256xf32> to vector<4x256xf32>
    %57 = arith.mulf %55, %56 : vector<4x256xf32>
    %c16 = arith.constant 16 : index
    %c0_55 = arith.constant 0 : index
    %58 = vector.load %arg12[%c16, %c0_55] : memref<72x256xf32, #tpu.memory_space<vmem>>, vector<4x256xf32>
    tpu.vector_store %arg12[%c16, %c0_55], %57 {strides = array<i32>} : memref<72x256xf32, #tpu.memory_space<vmem>>, vector<4x256xf32>,
    %c0_56 = arith.constant 0 : index
    %c2_57 = arith.constant 2 : index
    %59 = vector.load %arg10[%c0_56, %c2_57] : memref<4x290xf32, #tpu.memory_space<vmem>>, vector<4x256xf32>
    %60 = vector.broadcast %54 : vector<1x256xf32> to vector<4x256xf32>
    %61 = arith.mulf %59, %60 : vector<4x256xf32>
    %c20 = arith.constant 20 : index
    %c0_58 = arith.constant 0 : index
    %62 = vector.load %arg12[%c20, %c0_58] : memref<72x256xf32, #tpu.memory_space<vmem>>, vector<4x256xf32>
    tpu.vector_store %arg12[%c20, %c0_58], %61 {strides = array<i32>} : memref<72x256xf32, #tpu.memory_space<vmem>>, vector<4x256xf32>,
    %c3_59 = arith.constant 3 : index
    %c0_60 = arith.constant 0 : index
    %63 = vector.load %arg8[%c3_59, %c0_60] : memref<9x256xf32, #tpu.memory_space<vmem>>, vector<1x256xf32>
    %c0_61 = arith.constant 0 : index
    %c16_62 = arith.constant 16 : index
    %64 = vector.load %arg11[%c0_61, %c16_62] : memref<4x290xf32, #tpu.memory_space<vmem>>, vector<4x256xf32>
    %65 = vector.broadcast %63 : vector<1x256xf32> to vector<4x256xf32>
    %66 = arith.mulf %64, %65 : vector<4x256xf32>
    %c24 = arith.constant 24 : index
    %c0_63 = arith.constant 0 : index
    %67 = vector.load %arg12[%c24, %c0_63] : memref<72x256xf32, #tpu.memory_space<vmem>>, vector<4x256xf32>
    tpu.vector_store %arg12[%c24, %c0_63], %66 {strides = array<i32>} : memref<72x256xf32, #tpu.memory_space<vmem>>, vector<4x256xf32>,
    %c0_64 = arith.constant 0 : index
    %c16_65 = arith.constant 16 : index
    %68 = vector.load %arg10[%c0_64, %c16_65] : memref<4x290xf32, #tpu.memory_space<vmem>>, vector<4x256xf32>
    %69 = vector.broadcast %63 : vector<1x256xf32> to vector<4x256xf32>
    %70 = arith.mulf %68, %69 : vector<4x256xf32>
    %c28 = arith.constant 28 : index
    %c0_66 = arith.constant 0 : index
    %71 = vector.load %arg12[%c28, %c0_66] : memref<72x256xf32, #tpu.memory_space<vmem>>, vector<4x256xf32>
    tpu.vector_store %arg12[%c28, %c0_66], %70 {strides = array<i32>} : memref<72x256xf32, #tpu.memory_space<vmem>>, vector<4x256xf32>,
    %c4_67 = arith.constant 4 : index
    %c0_68 = arith.constant 0 : index
    %72 = vector.load %arg8[%c4_67, %c0_68] : memref<9x256xf32, #tpu.memory_space<vmem>>, vector<1x256xf32>
    %c0_69 = arith.constant 0 : index
    %c17_70 = arith.constant 17 : index
    %73 = vector.load %arg11[%c0_69, %c17_70] : memref<4x290xf32, #tpu.memory_space<vmem>>, vector<4x256xf32>
    %74 = vector.broadcast %72 : vector<1x256xf32> to vector<4x256xf32>
    %75 = arith.mulf %73, %74 : vector<4x256xf32>
    %c32 = arith.constant 32 : index
    %c0_71 = arith.constant 0 : index
    %76 = vector.load %arg12[%c32, %c0_71] : memref<72x256xf32, #tpu.memory_space<vmem>>, vector<4x256xf32>
    tpu.vector_store %arg12[%c32, %c0_71], %75 {strides = array<i32>} : memref<72x256xf32, #tpu.memory_space<vmem>>, vector<4x256xf32>,
    %c0_72 = arith.constant 0 : index
    %c17_73 = arith.constant 17 : index
    %77 = vector.load %arg10[%c0_72, %c17_73] : memref<4x290xf32, #tpu.memory_space<vmem>>, vector<4x256xf32>
    %78 = vector.broadcast %72 : vector<1x256xf32> to vector<4x256xf32>
    %79 = arith.mulf %77, %78 : vector<4x256xf32>
    %c36 = arith.constant 36 : index
    %c0_74 = arith.constant 0 : index
    %80 = vector.load %arg12[%c36, %c0_74] : memref<72x256xf32, #tpu.memory_space<vmem>>, vector<4x256xf32>
    tpu.vector_store %arg12[%c36, %c0_74], %79 {strides = array<i32>} : memref<72x256xf32, #tpu.memory_space<vmem>>, vector<4x256xf32>,
    %c5 = arith.constant 5 : index
    %c0_75 = arith.constant 0 : index
    %81 = vector.load %arg8[%c5, %c0_75] : memref<9x256xf32, #tpu.memory_space<vmem>>, vector<1x256xf32>
    %c0_76 = arith.constant 0 : index
    %c18 = arith.constant 18 : index
    %82 = vector.load %arg11[%c0_76, %c18] : memref<4x290xf32, #tpu.memory_space<vmem>>, vector<4x256xf32>
    %83 = vector.broadcast %81 : vector<1x256xf32> to vector<4x256xf32>
    %84 = arith.mulf %82, %83 : vector<4x256xf32>
    %c40 = arith.constant 40 : index
    %c0_77 = arith.constant 0 : index
    %85 = vector.load %arg12[%c40, %c0_77] : memref<72x256xf32, #tpu.memory_space<vmem>>, vector<4x256xf32>
    tpu.vector_store %arg12[%c40, %c0_77], %84 {strides = array<i32>} : memref<72x256xf32, #tpu.memory_space<vmem>>, vector<4x256xf32>,
    %c0_78 = arith.constant 0 : index
    %c18_79 = arith.constant 18 : index
    %86 = vector.load %arg10[%c0_78, %c18_79] : memref<4x290xf32, #tpu.memory_space<vmem>>, vector<4x256xf32>
    %87 = vector.broadcast %81 : vector<1x256xf32> to vector<4x256xf32>
    %88 = arith.mulf %86, %87 : vector<4x256xf32>
    %c44 = arith.constant 44 : index
    %c0_80 = arith.constant 0 : index
    %89 = vector.load %arg12[%c44, %c0_80] : memref<72x256xf32, #tpu.memory_space<vmem>>, vector<4x256xf32>
    tpu.vector_store %arg12[%c44, %c0_80], %88 {strides = array<i32>} : memref<72x256xf32, #tpu.memory_space<vmem>>, vector<4x256xf32>,
    %c6 = arith.constant 6 : index
    %c0_81 = arith.constant 0 : index
    %90 = vector.load %arg8[%c6, %c0_81] : memref<9x256xf32, #tpu.memory_space<vmem>>, vector<1x256xf32>
    %c0_82 = arith.constant 0 : index
    %c32_83 = arith.constant 32 : index
    %91 = vector.load %arg11[%c0_82, %c32_83] : memref<4x290xf32, #tpu.memory_space<vmem>>, vector<4x256xf32>
    %92 = vector.broadcast %90 : vector<1x256xf32> to vector<4x256xf32>
    %93 = arith.mulf %91, %92 : vector<4x256xf32>
    %c48 = arith.constant 48 : index
    %c0_84 = arith.constant 0 : index
    %94 = vector.load %arg12[%c48, %c0_84] : memref<72x256xf32, #tpu.memory_space<vmem>>, vector<4x256xf32>
    tpu.vector_store %arg12[%c48, %c0_84], %93 {strides = array<i32>} : memref<72x256xf32, #tpu.memory_space<vmem>>, vector<4x256xf32>,
    %c0_85 = arith.constant 0 : index
    %c32_86 = arith.constant 32 : index
    %95 = vector.load %arg10[%c0_85, %c32_86] : memref<4x290xf32, #tpu.memory_space<vmem>>, vector<4x256xf32>
    %96 = vector.broadcast %90 : vector<1x256xf32> to vector<4x256xf32>
    %97 = arith.mulf %95, %96 : vector<4x256xf32>
    %c52 = arith.constant 52 : index
    %c0_87 = arith.constant 0 : index
    %98 = vector.load %arg12[%c52, %c0_87] : memref<72x256xf32, #tpu.memory_space<vmem>>, vector<4x256xf32>
    tpu.vector_store %arg12[%c52, %c0_87], %97 {strides = array<i32>} : memref<72x256xf32, #tpu.memory_space<vmem>>, vector<4x256xf32>,
    %c7 = arith.constant 7 : index
    %c0_88 = arith.constant 0 : index
    %99 = vector.load %arg8[%c7, %c0_88] : memref<9x256xf32, #tpu.memory_space<vmem>>, vector<1x256xf32>
    %c0_89 = arith.constant 0 : index
    %c33 = arith.constant 33 : index
    %100 = vector.load %arg11[%c0_89, %c33] : memref<4x290xf32, #tpu.memory_space<vmem>>, vector<4x256xf32>
    %101 = vector.broadcast %99 : vector<1x256xf32> to vector<4x256xf32>
    %102 = arith.mulf %100, %101 : vector<4x256xf32>
    %c56 = arith.constant 56 : index
    %c0_90 = arith.constant 0 : index
    %103 = vector.load %arg12[%c56, %c0_90] : memref<72x256xf32, #tpu.memory_space<vmem>>, vector<4x256xf32>
    tpu.vector_store %arg12[%c56, %c0_90], %102 {strides = array<i32>} : memref<72x256xf32, #tpu.memory_space<vmem>>, vector<4x256xf32>,
    %c0_91 = arith.constant 0 : index
    %c33_92 = arith.constant 33 : index
    %104 = vector.load %arg10[%c0_91, %c33_92] : memref<4x290xf32, #tpu.memory_space<vmem>>, vector<4x256xf32>
    %105 = vector.broadcast %99 : vector<1x256xf32> to vector<4x256xf32>
    %106 = arith.mulf %104, %105 : vector<4x256xf32>
    %c60 = arith.constant 60 : index
    %c0_93 = arith.constant 0 : index
    %107 = vector.load %arg12[%c60, %c0_93] : memref<72x256xf32, #tpu.memory_space<vmem>>, vector<4x256xf32>
    tpu.vector_store %arg12[%c60, %c0_93], %106 {strides = array<i32>} : memref<72x256xf32, #tpu.memory_space<vmem>>, vector<4x256xf32>,
    %c8_94 = arith.constant 8 : index
    %c0_95 = arith.constant 0 : index
    %108 = vector.load %arg8[%c8_94, %c0_95] : memref<9x256xf32, #tpu.memory_space<vmem>>, vector<1x256xf32>
    %c0_96 = arith.constant 0 : index
    %c34 = arith.constant 34 : index
    %109 = vector.load %arg11[%c0_96, %c34] : memref<4x290xf32, #tpu.memory_space<vmem>>, vector<4x256xf32>
    %110 = vector.broadcast %108 : vector<1x256xf32> to vector<4x256xf32>
    %111 = arith.mulf %109, %110 : vector<4x256xf32>
    %c64 = arith.constant 64 : index
    %c0_97 = arith.constant 0 : index
    %112 = vector.load %arg12[%c64, %c0_97] : memref<72x256xf32, #tpu.memory_space<vmem>>, vector<4x256xf32>
    tpu.vector_store %arg12[%c64, %c0_97], %111 {strides = array<i32>} : memref<72x256xf32, #tpu.memory_space<vmem>>, vector<4x256xf32>,
    %c0_98 = arith.constant 0 : index
    %c34_99 = arith.constant 34 : index
    %113 = vector.load %arg10[%c0_98, %c34_99] : memref<4x290xf32, #tpu.memory_space<vmem>>, vector<4x256xf32>
    %114 = vector.broadcast %108 : vector<1x256xf32> to vector<4x256xf32>
    %115 = arith.mulf %113, %114 : vector<4x256xf32>
    %c68 = arith.constant 68 : index
    %c0_100 = arith.constant 0 : index
    %116 = vector.load %arg12[%c68, %c0_100] : memref<72x256xf32, #tpu.memory_space<vmem>>, vector<4x256xf32>
    tpu.vector_store %arg12[%c68, %c0_100], %115 {strides = array<i32>} : memref<72x256xf32, #tpu.memory_space<vmem>>, vector<4x256xf32>,
    %c0_101 = arith.constant 0 : index
    %c0_102 = arith.constant 0 : index
    %117 = vector.load %arg5[%c0_101, %c0_102] : memref<4x72xf32, #tpu.memory_space<vmem>>, vector<4x72xf32>
    %c0_103 = arith.constant 0 : index
    %c0_104 = arith.constant 0 : index
    %118 = vector.load %arg12[%c0_103, %c0_104] : memref<72x256xf32, #tpu.memory_space<vmem>>, vector<72x256xf32>
    %cst_105 = arith.constant dense<0.000000e+00> : vector<4x256xf32>
    %119 = tpu.matmul %117, %118, %cst_105 {dimension_numbers = #tpu.dot_dimension_numbers<[1], [0], [0], [1], [0, 0, 1, 1], [], []>} : vector<4x72xf32>, vector<72x256xf32>, vector<4x256xf32> -> vector<4x256xf32>
    %c0_106 = arith.constant 0 : index
    %c0_107 = arith.constant 0 : index
    %120 = vector.load %arg6[%c0_106, %c0_107] : memref<4x1xf32, #tpu.memory_space<vmem>>, vector<4x1xf32>
    %121 = vector.broadcast %120 : vector<4x1xf32> to vector<4x256xf32>
    %122 = arith.addf %119, %121 : vector<4x256xf32>
    %cst_108 = arith.constant 0.000000e+00 : f32
    %123 = vector.broadcast %cst_108 : f32 to vector<4x256xf32>
    %124 = arith.cmpf ogt, %122, %123 : vector<4x256xf32>
    %cst_109 = arith.constant 0.00999999977 : f32
    %125 = vector.broadcast %cst_109 : f32 to vector<4x256xf32>
    %126 = arith.mulf %125, %122 : vector<4x256xf32>
    %127 = arith.select %124, %122, %126 : vector<4x256xi1>, vector<4x256xf32>
    %c0_110 = arith.constant 0 : index
    %c0_111 = arith.constant 0 : index
    %c0_112 = arith.constant 0 : index
    %128 = vector.load %arg9[%c0_110, %c0_111, %c0_112] : memref<1x4x256xf32, #tpu.memory_space<vmem>>, vector<1x4x256xf32>
    %129 = vector.shape_cast %128 : vector<1x4x256xf32> to vector<4x256xf32>
    %130 = vector.shape_cast %127 : vector<4x256xf32> to vector<1x4x256xf32>
    tpu.vector_store %arg9[%c0_110, %c0_111, %c0_112], %130 {strides = array<i32>} : memref<1x4x256xf32, #tpu.memory_space<vmem>>, vector<1x4x256xf32>,
    return
  }
  func.func @transform_0(%arg0: i32) -> (i32, i32, i32) {
    %c0_i32 = arith.constant 0 : i32
    %c0_i32_0 = arith.constant 0 : i32
    %c0_i32_1 = arith.constant 0 : i32
    return %arg0, %c0_i32, %c0_i32_0 : i32, i32, i32
  }
  func.func @transform_1(%arg0: i32) -> (i32, i32, i32) {
    %c0_i32 = arith.constant 0 : i32
    %c0_i32_0 = arith.constant 0 : i32
    %c0_i32_1 = arith.constant 0 : i32
    return %arg0, %c0_i32, %c0_i32_0 : i32, i32, i32
  }
  func.func @transform_2(%arg0: i32) -> (i32, i32) {
    %c0_i32 = arith.constant 0 : i32
    %c0_i32_0 = arith.constant 0 : i32
    %c0_i32_1 = arith.constant 0 : i32
    return %c0_i32, %c0_i32_0 : i32, i32
  }
  func.func @transform_3(%arg0: i32) -> (i32, i32) {
    %c0_i32 = arith.constant 0 : i32
    %c0_i32_0 = arith.constant 0 : i32
    %c0_i32_1 = arith.constant 0 : i32
    return %c0_i32, %c0_i32_0 : i32, i32
  }
  func.func @transform_4(%arg0: i32) -> (i32, i32) {
    %c0_i32 = arith.constant 0 : i32
    %c0_i32_0 = arith.constant 0 : i32
    %c0_i32_1 = arith.constant 0 : i32
    return %c0_i32, %c0_i32_0 : i32, i32
  }
  func.func @transform_5(%arg0: i32) -> (i32, i32) {
    %c0_i32 = arith.constant 0 : i32
    %c0_i32_0 = arith.constant 0 : i32
    %c0_i32_1 = arith.constant 0 : i32
    return %c0_i32, %c0_i32_0 : i32, i32
  }
  func.func @transform_6(%arg0: i32) -> (i32, i32, i32) {
    %c0_i32 = arith.constant 0 : i32
    %c0_i32_0 = arith.constant 0 : i32
    %c0_i32_1 = arith.constant 0 : i32
    %c0_i32_2 = arith.constant 0 : i32
    return %c0_i32, %c0_i32_0, %c0_i32_1 : i32, i32, i32
  }
  func.func @transform_7(%arg0: i32) -> (i32, i32) {
    %c0_i32 = arith.constant 0 : i32
    %c0_i32_0 = arith.constant 0 : i32
    %c0_i32_1 = arith.constant 0 : i32
    return %c0_i32, %c0_i32_0 : i32, i32
  }
  func.func @transform_8(%arg0: i32) -> (i32, i32, i32) {
    %c0_i32 = arith.constant 0 : i32
    %c0_i32_0 = arith.constant 0 : i32
    %c0_i32_1 = arith.constant 0 : i32
    return %arg0, %c0_i32, %c0_i32_0 : i32, i32, i32
  }
}

</mosaic_0001>

<bundles_post_ra>
// kernel: decoder_pallas.1
= control target key start
LH: loop header
LB: loop body
LE: loop exit
PB: predicated region body
PF: predicated region fallthrough
CT: control target
= control target key end

     0   :  { %s1765_s27 = smov 0   ;;  %s2295_s0 = inlined_call_operand.vmem [shape: f32[2,4,64], index: 0, kind: input, shape index: {}]   ;;  %s2296_s1 = inlined_call_operand.vmem [shape: f32[2,4,256], index: 1, kind: input, shape index: {}]   ;;  %s2297_s2 = inlined_call_operand.vmem [shape: f32[16,4], index: 2, kind: input, shape index: {}]   ;;  %s2298_s3 = inlined_call_operand.vmem [shape: f32[4,1], index: 3, kind: input, shape index: {}]   ;;  %s2299_s4 = inlined_call_operand.vmem [shape: f32[4,72], index: 4, kind: input, shape index: {}]   ;;  %s2300_s5 = inlined_call_operand.vmem [shape: f32[4,1], index: 5, kind: input, shape index: {}]   ;;  %s2301_s6 = inlined_call_operand.vmem [shape: f32[4,64,256], index: 6, kind: input, shape index: {}]   ;;  %s2302_s7 = inlined_call_operand.vmem [shape: f32[9,256], index: 7, kind: input, shape index: {}]   ;;  %s2303_s8 = inlined_call_operand.vmem [shape: f32[2,4,256], index: 8, kind: output, shape index: {}]  }
   0x1 LB: > { %s1494_s28 = sadd.s32 4294967295, %s1700_s27   ;;  %p1498_p0 = scmp.ge.s32.totalorder %s1700_s27, 1  ;;  %s1700_s27 = sphi %s1765_s27, %s18_s27  }
   0x2   : > { %p271_p1 = scmp.lt.s32.totalorder %s1700_s27, 3 }
   0x4   : > { %p272_p2 = pnand %p1498_p0, %p271_p1 }
   0x5   : > { %p309_p3 = scmp.lt.s32.totalorder (!%p272_p2), %s1494_s28, 1  ;;  %v323_v0 = vld [vmem:[%s2297_s2] sm:$0xff] (!%p272_p2)  ;;  %vm326_vm0 = vcmask (!%p272_p2), 31744   ;;  %v413_v1 = vld [vmem:[%s2301_s6 + $0x8] sm:$0xff] (!%p272_p2)  ;;  %v415_v2 = vld [vmem:[%s2301_s6 + $0x18] sm:$0xff] (!%p272_p2)  ;;  %vm333_vm1 = vcmask (!%p272_p2), 1043456   ;;  %v822_v56 = vlaneseq (!%p272_p2) }
   0x6   : > { %275 = sbr.rel (%p272_p2) target bundleno = 1017 (0x3f9), region = 52  ;;  %1577 = vmatprep.mubr.msk.f32.mxu0 (!%p272_p2), %vm326_vm0, %v323_v0  ;;  %v412_v3 = vld [vmem:[%s2301_s6] sm:$0xff] (!%p272_p2)  ;;  %v414_v4 = vld [vmem:[%s2301_s6 + $0x10] sm:$0xff] (!%p272_p2)  ;;  %v1596_v5 = vpack.c.bf16 (!%p272_p2), %v415_v2, %v413_v1  ;;  %v1508_v7 = vld [vmem:[%s2301_s6 + $0x88] sm:$0xff] (!%p272_p2)  ;;  %v1702_v54 = vmov (!%p272_p2), 0.0   ;;  %vm788_vm2 = vcmask (!%p272_p2), 134144  }
   0x7   : > { %v1598_v6 = vpack.c.bf16 (!%p272_p2), %v414_v4, %v412_v3  ;;  %v1510_v8 = vld [vmem:[%s2301_s6 + $0x98] sm:$0xff] (!%p272_p2)  ;;  %v1507_v9 = vld [vmem:[%s2301_s6 + $0x80] sm:$0xff] (!%p272_p2)  ;;  %v1509_v10 = vld [vmem:[%s2301_s6 + $0x90] sm:$0xff] (!%p272_p2)  ;;  %587 = vmatprep.mubr.f32.mxu1 (!%p272_p2), %v1702_v54  ;;  %v1703_v57 = vmov (!%p272_p2), 0   ;;  %807 = vst.msk [vmem:[#allocation2] sm:$0xf] (!%p272_p2), %vm788_vm2, %v1702_v54 }
   0x8   : > { %v417_v11 = vld [vmem:[%s2301_s6 + $0x28] sm:$0xff] (!%p272_p2)  ;;  %v419_v12 = vld [vmem:[%s2301_s6 + $0x38] sm:$0xff] (!%p272_p2)  ;;  %1597 = vmatprep.subr.bf16.mxu1 (!%p272_p2), %v1596_v5  ;;  %v416_v14 = vld [vmem:[%s2301_s6 + $0x20] sm:$0xff] (!%p272_p2)  ;;  %v1580_v18 = vpack.c.bf16 (!%p272_p2), %v1510_v8, %v1508_v7  ;;  %v1582_v22 = vpack.c.bf16 (!%p272_p2), %v1509_v10, %v1507_v9  ;;  %1692 = vset.pattern.permute.xlu0 (!%p272_p2), %v1703_v57  ;;  %789 = vst.msk [vmem:[#allocation3] sm:$0xf] (!%p272_p2), %vm788_vm2, %v1702_v54  ;;  %v823_v59 = vshrl.u32 (!%p272_p2), %v822_v56, 7 }
   0x9   : > { %v1600_v13 = vpack.c.bf16 (!%p272_p2), %v419_v12, %v417_v11  ;;  %v418_v15 = vld [vmem:[%s2301_s6 + $0x30] sm:$0xff] (!%p272_p2)  ;;  %v1512_v16 = vld [vmem:[%s2301_s6 + $0xa8] sm:$0xff] (!%p272_p2)  ;;  %1599 = vmatpush1.bf16.msra.mxu1 (!%p272_p2), %v1598_v6  ;;  %v1514_v19 = vld [vmem:[%s2301_s6 + $0xb8] sm:$0xff] (!%p272_p2)  ;;  %1693 = vset.pattern.permute.xlu1 (!%p272_p2), %v1703_v57  ;;  %vm790_vm3 = vcmask (!%p272_p2), 273544   ;;  %s1704_s11 = smov (!%p272_p2), 17   ;;  %s1705_s24 = smov (!%p272_p2), 1  }
   0xa   : > { %v324_v17 = vld [vmem:[%s2297_s2 + $0x8] sm:$0xff] (!%p272_p2)  ;;  %v1511_v20 = vld [vmem:[%s2301_s6 + $0xa0] sm:$0xff] (!%p272_p2)  ;;  %v1602_v23 = vpack.c.bf16 (!%p272_p2), %v418_v15, %v416_v14  ;;  %v423_v25 = vld [vmem:[%s2301_s6 + $0x58] sm:$0xff] (!%p272_p2)  ;;  %v1584_v26 = vpack.c.bf16 (!%p272_p2), %v1514_v19, %v1512_v16  ;;  %808 = vst.msk [vmem:[#allocation2 + $0x8] sm:$0xf] (!%p272_p2), %vm790_vm3, %v1702_v54  ;;  %v824_v63 = vsub.s32 (!%p272_p2), 0, %v823_v59 }
   0xb   : > { %1601 = vmatprep.subr.bf16.mxu1 (!%p272_p2), %v1600_v13  ;;  %v421_v24 = vld [vmem:[%s2301_s6 + $0x48] sm:$0xff] (!%p272_p2)  ;;  %v1513_v27 = vld [vmem:[%s2301_s6 + $0xb0] sm:$0xff] (!%p272_p2)  ;;  %v420_v29 = vld [vmem:[%s2301_s6 + $0x40] sm:$0xff] (!%p272_p2)  ;;  %791 = vst.msk [vmem:[#allocation3 + $0x8] sm:$0xf] (!%p272_p2), %vm790_vm3, %v1702_v54  ;;  %v828_v0 = vsub.s32 (!%p272_p2), 1, %v823_v59 }
   0xc   : > { %v1604_v28 = vpack.c.bf16 (!%p272_p2), %v423_v25, %v421_v24  ;;  %v422_v30 = vld [vmem:[%s2301_s6 + $0x50] sm:$0xff] (!%p272_p2)  ;;  %v1516_v31 = vld [vmem:[%s2301_s6 + $0xc8] sm:$0xff] (!%p272_p2)  ;;  %v1518_v32 = vld [vmem:[%s2301_s6 + $0xd8] sm:$0xff] (!%p272_p2)  ;;  %v1586_v35 = vpack.c.bf16 (!%p272_p2), %v1513_v27, %v1511_v20  ;;  %s1706_s26 = smov (!%p272_p2), 2   ;;  %s1707_s12 = smov (!%p272_p2), 16   ;;  %vm447_vm4 = vcmask (!%p272_p2), 523264  }
   0xd   : > { %s2307_s28 = smov (!%p309_p3, %s1494_s28), 1  ;;  %v425_v33 = vld [vmem:[%s2301_s6 + $0x68] sm:$0xff]  ;;  %v427_v34 = vld [vmem:[%s2301_s6 + $0x78] sm:$0xff]  ;;  %1603 = vmatpush1.bf16.msra.mxu1 %v1602_v23  ;;  %v1606_v36 = vpack.c.bf16 %v422_v30, %v420_v29  ;;  %v1515_v37 = vld [vmem:[%s2301_s6 + $0xc0] sm:$0xff]  ;;  %v1588_v38 = vpack.c.bf16 %v1518_v32, %v1516_v31  ;;  %s1708_s13 = smov 18   ;;  %vm802_vm5 = vcmask 1043592  }
   0xe   : > { %s1499_s9 = sshll.u32 %s2307_s28, 2  ;;  %1605 = vmatprep.subr.bf16.mxu1 %v1604_v28  ;;  %v1517_v39 = vld [vmem:[%s2301_s6 + $0xd0] sm:$0xff]  ;;  %v1608_v40 = vpack.c.bf16 %v427_v34, %v425_v33  ;;  %v424_v41 = vld [vmem:[%s2301_s6 + $0x60] sm:$0xff]  ;;  %v1520_v45 = vld [vmem:[%s2301_s6 + $0xe8] sm:$0xff]  ;;  %s1570_s25 = sshll.u32 %s2307_s28, 3  ;;  %vm803_vm6 = vcmask 1047556  }
   0xf   : > { %s312_s18 = scalar_lea.vmem %s2295_s0, %s1499_s9  ;;  %v426_v42 = vld [vmem:[%s2301_s6 + $0x70] sm:$0xff]  ;;  %v1590_v43 = vpack.c.bf16 %v1517_v39, %v1515_v37  ;;  %v1522_v46 = vld [vmem:[%s2301_s6 + $0xf8] sm:$0xff]  ;;  %v1519_v48 = vld [vmem:[%s2301_s6 + $0xe0] sm:$0xff]  ;;  %s317_s30 = scalar_lea.vmem %s2296_s1, %s1570_s25  ;;  %vm798_vm7 = vcmask 138240   ;;  %vm862_vm9 = vcmask 7168   ;;  %vm921_vm10 = vcmask 15360  }
  0x10   : > { %v325_v21 = vld [vmem:[%s312_s18] sm:$0xf]  ;;  %v1610_v44 = vpack.c.bf16 %v426_v42, %v424_v41  ;;  %v1592_v47 = vpack.c.bf16 %v1522_v46, %v1520_v45  ;;  %v1521_v49 = vld [vmem:[%s2301_s6 + $0xf0] sm:$0xff]  ;;  %v1526_v50 = vld [vmem:[%s2301_s6 + $0x108] sm:$0xff]  ;;  %s1709_s14 = smov 32   ;;  %s1710_s15 = smov 33  }
  0x11   : > { %1575 = vmatprep.subr.msk.mxu0 %vm333_vm1, %v325_v21  ;;  %1607 = vmatpush1.bf16.msra.mxu1 %v1606_v36  ;;  %v1594_v51 = vpack.c.bf16 %v1521_v49, %v1519_v48  ;;  %v1528_v52 = vld [vmem:[%s2301_s6 + $0x118] sm:$0xff]  ;;  %v780_v55 = vld [vmem:[%s2298_s3] sm:$0xf]  ;;  %v1562_v1 = vld [vmem:[%s2302_s7 + $0x4] ss:$8 sm:$0x3]  ;;  %s322_s18 = scalar_lea.vmem %s2303_s8, %s1570_s25 }
  0x12   : > { %1576 = vmatpush3.msk.msra.mxu0 %vm333_vm1, %v325_v21  ;;  %1609 = vmatprep.subr.bf16.mxu1 %v1608_v40  ;;  %v1612_v53 = vpack.c.bf16 %v1528_v52, %v1526_v50  ;;  %v809_v58 = vld [vmem:[%s317_s30] sm:$0xff]  ;;  %v1030_v10 = vrot.slane %v1562_v1, %v824_v63  ;;  %v1034_v11 = vrot.slane %v1562_v1, %v828_v0  ;;  %s1711_s16 = smov 34   ;;  %v1530_v36 = vld [vmem:[%s2301_s6 + $0x128] sm:$0xff]  ;;  %v1532_v37 = vld [vmem:[%s2301_s6 + $0x138] sm:$0xff]  ;;  %vm980_vm11 = vcmask 130048   ;;  %s1712_s23 = smov 127  }
  0x13   : > { %1578 = vmatmul.mubr.msk.f32.vlgmr.msra.gmra.mrb[0].mxu0 %vm326_vm0, %v324_v17  ;;  %1581 = vmatprep.subr.bf16.mxu0 %v1580_v18  ;;  %v1559_v60 = vld [vmem:[%s2302_s7 + $0x1] ss:$8 sm:$0x3]  ;;  %v1560_v61 = vld [vmem:[%s2302_s7 + $0x2] ss:$8 sm:$0x3]  ;;  %v1616_v40 = vpack.c.bf16 %v1532_v37, %v1530_v36  ;;  %vm2038_vm8 = vmor %vm803_vm6, %vm802_vm5 }
  0x14   : > { %1583 = vmatpush1.bf16.msra.mxu0 %v1582_v22  ;;  %514 = vmatprep.mubr.f32.mxu0 %v1702_v54  ;;  %v1561_v62 = vld [vmem:[%s2302_s7 + $0x3] ss:$8 sm:$0x3]  ;;  %v853_v2 = vrot.slane %v1559_v60, %v824_v63  ;;  %v857_v3 = vrot.slane %v1559_v60, %v828_v0  ;;  %v912_v4 = vrot.slane %v1560_v61, %v824_v63  ;;  %v1563_v6 = vld [vmem:[%s2302_s7 + $0x5] ss:$8 sm:$0x3] }
  0x15   : > { %1585 = vmatprep.subr.bf16.mxu0 %v1584_v26  ;;  %1611 = vmatpush1.bf16.msra.mxu1 %v1610_v44  ;;  %v916_v5 = vrot.slane %v1560_v61, %v828_v0  ;;  %v1564_v7 = vld [vmem:[%s2302_s7 + $0x6] ss:$8 sm:$0x3]  ;;  %v971_v8 = vrot.slane %v1561_v62, %v824_v63  ;;  %v975_v9 = vrot.slane %v1561_v62, %v828_v0  ;;  %v819_v14 = vld [vmem:[%s2302_s7] ss:$8 sm:$0x3] }
  0x16   : > { %1613 = vmatprep.subr.bf16.mxu1 %v1612_v53  ;;  %783 = vperm.xlu0 %1692, %v780_v55   ;;  %v858_v12 = vcombine.low %v853_v2, %v857_v3  ;;  %v1088_v15 = vrot.slane %v1563_v6, %v824_v63  ;;  %v1092_v16 = vrot.slane %v1563_v6, %v828_v0  ;;  %v1565_v21 = vld [vmem:[%s2302_s7 + $0x7] ss:$8 sm:$0x3]  ;;  %v1566_v22 = vld [vmem:[%s2302_s7 + $0x10] ss:$8 sm:$0x3] }
  0x17   : > { %811 = vrot.lane.b32.xlu1 %v809_v58, %s1704_s11  ;;  %v917_v13 = vcombine.low %v912_v4, %v916_v5  ;;  %v1147_v17 = vrot.slane %v1564_v7, %v824_v63  ;;  %v1151_v18 = vrot.slane %v1564_v7, %v828_v0  ;;  %v976_v19 = vcombine.low %v971_v8, %v975_v9  ;;  %v1525_v34 = vld [vmem:[%s2301_s6 + $0x100] sm:$0xff]  ;;  %v1531_v42 = vld [vmem:[%s2301_s6 + $0x130] sm:$0xff]  ;;  %v1534_v44 = vld [vmem:[%s2301_s6 + $0x148] sm:$0xff]  ;;  %s1715_s29 = smov 111   ;;  %s1716_s30 = smov 110  }
  0x18   : > { %1587 = vmatpush1.bf16.msra.mxu0 %v1586_v35  ;;  %v1035_v20 = vcombine.low %v1030_v10, %v1034_v11  ;;  %v825_v23 = vrot.slane %v819_v14, %v824_v63  ;;  %v829_v24 = vrot.slane %v819_v14, %v828_v0  ;;  %v1093_v25 = vcombine.low %v1088_v15, %v1092_v16  ;;  %v1527_v35 = vld [vmem:[%s2301_s6 + $0x110] sm:$0xff]  ;;  %v1529_v41 = vld [vmem:[%s2301_s6 + $0x120] sm:$0xff]  ;;  %v1536_v45 = vld [vmem:[%s2301_s6 + $0x158] sm:$0xff]  ;;  %s1717_s9 = smov 96   ;;  %s1718_s10 = smov 95  }
  0x19   : > { %1589 = vmatprep.subr.bf16.mxu0 %v1588_v38  ;;  %v1152_v26 = vcombine.low %v1147_v17, %v1151_v18  ;;  %v1206_v27 = vrot.slane %v1565_v21, %v824_v63  ;;  %v1210_v28 = vrot.slane %v1565_v21, %v828_v0  ;;  %v1265_v29 = vrot.slane %v1566_v22, %v824_v63  ;;  %v1533_v49 = vld [vmem:[%s2301_s6 + $0x140] sm:$0xff]  ;;  %v1535_v50 = vld [vmem:[%s2301_s6 + $0x150] sm:$0xff]  ;;  %v1540_v52 = vld [vmem:[%s2301_s6 + $0x178] sm:$0xff] }
  0x1a   : > { %918 = vrot.lane.b32.xlu0 %v917_v13, %s1706_s26  ;;  %v1269_v30 = vrot.slane %v1566_v22, %v828_v0  ;;  %v1937_v31 = vcombine.low %v825_v23, %v829_v24  ;;  %v1614_v38 = vpack.c.bf16 %v1527_v35, %v1525_v34  ;;  %v1620_v48 = vpack.c.bf16 %v1536_v45, %v1534_v44  ;;  %v1537_v56 = vld [vmem:[%s2301_s6 + $0x160] sm:$0xff]  ;;  %v1539_v57 = vld [vmem:[%s2301_s6 + $0x170] sm:$0xff]  ;;  %v1543_v58 = vld [vmem:[%s2301_s6 + $0x188] sm:$0xff]  ;;  %s1714_s26 = smov 112  }
  0x1b   : > { %859 = vrot.lane.b32.xlu1 %v858_v12, %s1705_s24  ;;  %v1211_v32 = vcombine.low %v1206_v27, %v1210_v28  ;;  %v1622_v53 = vpack.c.bf16 %v1535_v50, %v1533_v49  ;;  %v1545_v59 = vld [vmem:[%s2301_s6 + $0x198] sm:$0xff]  ;;  %v1626_v60 = vpack.c.bf16 %v1539_v57, %v1537_v56  ;;  %v1542_v62 = vld [vmem:[%s2301_s6 + $0x180] sm:$0xff]  ;;  %v1544_v63 = vld [vmem:[%s2301_s6 + $0x190] sm:$0xff]  ;;  %s1713_s24 = smov 126   ;;  %vm1097_vm12 = vcmask 146432  }
  0x1c   : > { %1591 = vmatpush1.bf16.msra.mxu0 %v1590_v43  ;;  %v1270_v33 = vcombine.low %v1265_v29, %v1269_v30  ;;  %v1628_v61 = vpack.c.bf16 %v1545_v59, %v1543_v58  ;;  %v1547_v0 = vld [vmem:[%s2301_s6 + $0x1a8] sm:$0xff]  ;;  %v1549_v1 = vld [vmem:[%s2301_s6 + $0x1b8] sm:$0xff]  ;;  %v1630_v2 = vpack.c.bf16 %v1544_v63, %v1542_v62  ;;  %v1546_v4 = vld [vmem:[%s2301_s6 + $0x1a0] sm:$0xff]  ;;  %vm1156_vm13 = vcmask 261120  }
  0x1d   : > { %1593 = vmatprep.subr.bf16.mxu0 %v1592_v47  ;;  %v1618_v47 = vpack.c.bf16 %v1531_v42, %v1529_v41  ;;  %v1632_v3 = vpack.c.bf16 %v1549_v1, %v1547_v0  ;;  %v1548_v5 = vld [vmem:[%s2301_s6 + $0x1b0] sm:$0xff]  ;;  %v1551_v6 = vld [vmem:[%s2301_s6 + $0x1c8] sm:$0xff]  ;;  %v1553_v7 = vld [vmem:[%s2301_s6 + $0x1d8] sm:$0xff]  ;;  %vm1215_vm14 = vcmask 269312   ;;  %vm1274_vm15 = vcmask 277504  }
  0x1e   : > { %1036 = vrot.lane.b32.xlu0 %v1035_v20, %s1704_s11  ;;  %v1634_v8 = vpack.c.bf16 %v1548_v5, %v1546_v4  ;;  %v1636_v9 = vpack.c.bf16 %v1553_v7, %v1551_v6  ;;  %v1550_v10 = vld [vmem:[%s2301_s6 + $0x1c0] sm:$0xff]  ;;  %v1552_v11 = vld [vmem:[%s2301_s6 + $0x1d0] sm:$0xff]  ;;  %v1555_v12 = vld [vmem:[%s2301_s6 + $0x1e8] sm:$0xff]  ;;  %vm877_vm0 = vcmask 1039360   ;;  %vm936_vm1 = vcmask 1031168  }
  0x1f   : > { %977 = vrot.lane.b32.xlu1 %v976_v19, %s1707_s12  ;;  %v1557_v13 = vld [vmem:[%s2301_s6 + $0x1f8] sm:$0xff]  ;;  %v1554_v16 = vld [vmem:[%s2301_s6 + $0x1e0] sm:$0xff]  ;;  %v1556_v17 = vld [vmem:[%s2301_s6 + $0x1f0] sm:$0xff]  ;;  %s1719_s12 = smov 94   ;;  %vm995_vm3 = vcmask 916480   ;;  %vm1171_vm5 = vcmask 785408  }
  0x20   : > { %1595 = vmatpush1.bf16.msra.mxu0 %v1594_v51  ;;  %v1538_v51 = vld [vmem:[%s2301_s6 + $0x168] sm:$0xff]  ;;  %v1640_v15 = vpack.c.bf16 %v1557_v13, %v1555_v12  ;;  %v1642_v21 = vpack.c.bf16 %v1556_v17, %v1554_v16  ;;  %vm1230_vm6 = vcmask 777216  }
  0x21   : > { %v1624_v55 = vpack.c.bf16 %v1540_v52, %v1538_v51 }
  0x22   : > { %1153 = vrot.lane.b32.xlu0 %v1152_v26, %s1709_s14 }
  0x23   : > { %1094 = vrot.lane.b32.xlu1 %v1093_v25, %s1708_s13 }
  0x26   : > { %1271 = vrot.lane.b32.xlu0 %v1270_v33, %s1711_s16 }
  0x27   : > { %1212 = vrot.lane.b32.xlu1 %v1211_v32, %s1710_s15 }
  0x89   : > { %v812_v14 = vpop.permute.xlu1 %811 }
  0x8a   : > { %v813_v19 = vrot.slane %v812_v14, 4 }
  0x8c   : > { %v814_v20 = vsel %vm798_vm7, %v813_v19, %v812_v14  ;;  %818 = vst.msk [vmem:[#allocation2 + $0x8] sm:$0xf] %vm788_vm2, %v813_v19 }
  0x8d   : > { %817 = vst.msk [vmem:[#allocation2] sm:$0xff] %vm2038_vm8, %v814_v20  ;;  %v860_v27 = vpop.permute.xlu1 %859 }
  0x8e   : > { %v2051_v28 = vrot.slane %v860_v27, 4 }
  0x90   : > { %v2054_v30 = vsel %vm862_vm9, %v2051_v28, %v860_v27 }
  0x91   : > { %v978_v35 = vpop.permute.xlu1 %977 }
  0x93   : > { %v944_v12 = vld [vmem:[#allocation2 + $0x8] sm:$0xf] }
  0x94   : > { %v838_v23 = vld [vmem:[#allocation2] sm:$0xff]  ;;  %v1003_v14 = vld [vmem:[#allocation2 + $0x8] sm:$0xf] }
  0x95   : > { %v839_v24 = vmul.f32 %v838_v23, %v1937_v31  ;;  %v2049_v26 = vpop.permute.xlu0 %783  ;;  %v2059_v33 = vmul.f32 %v2054_v30, %v838_v23  ;;  %v1095_v41 = vpop.permute.xlu1 %1094  ;;  %v1061_v20 = vld [vmem:[#allocation2 + $0x8] sm:$0xf] }
  0x96   : > { %v2085_v44 = vrot.slane %v1095_v41, 4 }
  0x97   : > { %v841_v25 = vcombine.low %v839_v24, %v839_v24  ;;  %844 = vst [vmem:[#allocation4 + $0x8] sm:$0xf0] %v839_v24  ;;  %894 = vrot.lane.b32.xlu1 %v2059_v33, %s1712_s23  ;;  %v890_v13 = vcombine.low %v2059_v33, %v2059_v33 }
  0x99   : > { %843 = vst [vmem:[#allocation4] sm:$0xf0] %v841_v25  ;;  %v919_v29 = vpop.permute.xlu0 %918  ;;  %v1213_v49 = vpop.permute.xlu1 %1212 }
  0x9a   : > { %v2056_v32 = vrot.slane %v919_v29, 4  ;;  %v2105_v52 = vrot.slane %v1213_v49, 4 }
  0x9c   : > { %v2062_v34 = vsel %vm921_vm10, %v2056_v32, %v919_v29  ;;  %v2113_v56 = vsel %vm1215_vm14, %v2105_v52, %v1213_v49  ;;  %v1179_v29 = vld [vmem:[#allocation2 + $0x8] sm:$0xf] }
  0x9d   : > { %v1037_v36 = vpop.permute.xlu0 %1036  ;;  %v2065_v37 = vmul.f32 %v2062_v34, %v838_v23  ;;  %v2118_v58 = vmul.f32 %v2113_v56, %v838_v23 }
  0x9f   : > { %953 = vrot.lane.b32.xlu1 %v2065_v37, %s1713_s24  ;;  %v949_v19 = vcombine.low %v2065_v37, %v2065_v37  ;;  %v1243_v49 = vcombine.low %v2118_v58, %v2118_v58 }
  0xa1   : > { %v1154_v45 = vpop.permute.xlu0 %1153 }
  0xe6   : > { %v1951_v39 = vpop.f32.mrb[0].mxu0 }
  0xe7   : > { %v403_v43 = vpop.f32.mrb[1].mxu0  ;;  %v704_v22 = vrot.slane %v1951_v39, 4 }
  0xe8   : > { %v446_v46 = vrot.slane %v403_v43, 4  ;;  %1524 = vmatmul.mubr.msk.f32.vlgmr.msra.gmra.mrb[0].mxu1 %vm447_vm4, %v403_v43 }
  0xe9   : > { %1615 = vmatpush1.bf16.msra.mxu1 %v1614_v38  ;;  %678 = vmatprep.mubr.f32.mxu1 %v1702_v54  ;;  %v2069_v38 = vrot.slane %v978_v35, 4 }
  0xea   : > { %1523 = vmatmul.mubr.msk.f32.vlgmr.msra.gmra.mrb[2].mxu0 %vm447_vm4, %v446_v46  ;;  %1617 = vmatprep.subr.bf16.mxu1 %v1616_v40 }
  0xeb   : > { %1409 = vmatprep.mubr.f32.mxu0 %v1702_v54  ;;  %v2074_v40 = vsel %vm980_vm11, %v2069_v38, %v978_v35  ;;  %v1005_v16 = vmul.f32 %v1003_v14, %v2069_v38 }
  0xec   : > { %v2077_v42 = vmul.f32 %v2074_v40, %v838_v23 }
  0xed   : > { %1619 = vmatpush1.bf16.msra.mxu1 %v1618_v47  ;;  %v2093_v47 = vsel %vm1097_vm12, %v2085_v44, %v1095_v41  ;;  %v1009_v17 = vcombine.low %v1005_v16, %v1005_v16 }
  0xee   : > { %1621 = vmatprep.subr.bf16.mxu1 %v1620_v48  ;;  %1012 = vrot.lane.b32.xlu1 %v2077_v42, %s1714_s26  ;;  %v2095_v48 = vrot.slane %v1154_v45, 4  ;;  %v2098_v50 = vmul.f32 %v2093_v47, %v838_v23 }
  0xf0   : > { %v2103_v51 = vsel %vm1156_vm13, %v2095_v48, %v1154_v45  ;;  %v1125_v33 = vcombine.low %v2098_v50, %v2098_v50  ;;  %v1181_v35 = vmul.f32 %v1179_v29, %v2095_v48 }
  0xf1   : > { %1623 = vmatpush1.bf16.msra.mxu1 %v1622_v53  ;;  %v1272_v53 = vpop.permute.xlu0 %1271 }
  0xf2   : > { %1625 = vmatprep.subr.bf16.mxu1 %v1624_v55  ;;  %v2108_v55 = vmul.f32 %v2103_v51, %v838_v23  ;;  %v2115_v57 = vrot.slane %v1272_v53, 4  ;;  %v1185_v37 = vcombine.low %v1181_v35, %v1181_v35 }
  0xf4   : > { %v2123_v59 = vsel %vm1274_vm15, %v2115_v57, %v1272_v53  ;;  %v1184_v45 = vcombine.low %v2108_v55, %v2108_v55 }
  0xf5   : > { %1627 = vmatpush1.bf16.msra.mxu1 %v1626_v60  ;;  %v885_v60 = vld [vmem:[#allocation2 + $0x8] sm:$0xf] }
  0xf6   : > { %1629 = vmatprep.subr.bf16.mxu1 %v1628_v61  ;;  %v2128_v61 = vmul.f32 %v2123_v59, %v838_v23  ;;  %v887_v62 = vmul.f32 %v885_v60, %v2051_v28 }
  0xf8   : > { %1541 = vmatmul.mubr.msk.f32.vlgmr.msra.gmra.mrb[0].mxu1 %vm447_vm4, %v1951_v39  ;;  %v2071_v39 = vrot.slane %v1037_v36, 4  ;;  %v891_v63 = vcombine.low %v887_v62, %v887_v62 }
  0xf9   : > { %1631 = vmatpush1.bf16.msra.mxu1 %v1630_v2  ;;  %771 = vmatprep.mubr.f32.mxu1 %v1702_v54  ;;  %v1638_v54 = vpack.c.bf16 %v1552_v11, %v1550_v10 }
  0xfa   : > { %1633 = vmatprep.subr.bf16.mxu1 %v1632_v3  ;;  %v2083_v43 = vsel %vm798_vm7, %v2071_v39, %v1037_v36  ;;  %896 = vrot.lane.b32.xlu0 %v891_v63, %s1712_s23  ;;  %v1238_v36 = vld [vmem:[#allocation2 + $0x8] sm:$0xf] }
  0xfb   : > { %v2088_v46 = vmul.f32 %v2083_v43, %v838_v23  ;;  %v1120_v23 = vld [vmem:[#allocation2 + $0x8] sm:$0xf]  ;;  %v1240_v41 = vmul.f32 %v1238_v36, %v2105_v52 }
  0xfc   : > { %v1122_v25 = vmul.f32 %v1120_v23, %v2085_v44 }
  0xfd   : > { %1635 = vmatpush1.bf16.msra.mxu1 %v1634_v8  ;;  %1070 = vrot.lane.b32.xlu1 %v2088_v46, %s1715_s29  ;;  %v1066_v27 = vcombine.low %v2088_v46, %v2088_v46  ;;  %v1297_v46 = vld [vmem:[#allocation2 + $0x8] sm:$0xf] }
  0xfe   : > { %1637 = vmatprep.subr.bf16.mxu1 %v1636_v9 }
 0x101   : > { %1639 = vmatpush1.bf16.msra.mxu1 %v1638_v54  ;;  %1129 = vrot.lane.b32.xlu1 %v2098_v50, %s1716_s30  ;;  %v946_v54 = vmul.f32 %v944_v12, %v2056_v32  ;;  %v1299_v50 = vmul.f32 %v1297_v46, %v2115_v57 }
 0x102   : > { %1641 = vmatprep.subr.bf16.mxu1 %v1640_v15 }
 0x103   : > { %v950_v15 = vcombine.low %v946_v54, %v946_v54  ;;  %v1303_v53 = vcombine.low %v1299_v50, %v1299_v50 }
 0x105   : > { %1643 = vmatpush1.bf16.msra.mxu1 %v1642_v21  ;;  %1188 = vrot.lane.b32.xlu1 %v2108_v55, %s1717_s9  ;;  %v1008_v21 = vcombine.low %v2077_v42, %v2077_v42  ;;  %v1244_v42 = vcombine.low %v1240_v41, %v1240_v41 }
 0x108   : > { %1558 = vmatmul.mubr.msk.f32.vlgmr.msra.gmra.mrb[0].mxu1 %vm447_vm4, %v704_v22  ;;  %v1063_v22 = vmul.f32 %v1061_v20, %v2071_v39  ;;  %vm1112_vm4 = vcmask 900096  }
 0x109   : > { %1247 = vrot.lane.b32.xlu1 %v2118_v58, %s1718_s10  ;;  %v895_v2 = vpop.permute.xlu1 %894 }
 0x10a   : > { %v1067_v24 = vcombine.low %v1063_v22, %v1063_v22 }
 0x10d   : > { %1306 = vrot.lane.b32.xlu1 %v2128_v61, %s1719_s12 }
 0x111   : > { %v954_v58 = vpop.permute.xlu1 %953 }
 0x16c   : > { %v897_v3 = vpop.permute.xlu0 %896 }
 0x16d   : > { %v899_v4 = vsel %vm877_vm0, %v895_v2, %v897_v3 }
 0x16e   : > { %903 = vst [vmem:[#allocation4 + $0x18] sm:$0xf0] %v899_v4 }
 0x1bd   : > { %v516_v0 = vpop.f32.mrb[2].mxu0 }
 0x1be   : > { %v518_v1 = vpop.f32.mrb[3].mxu0 }
 0x1db   : > { %v773_v5 = vpop.f32.mrb[0].mxu1 }
 0x1dc   : > { %v1660_v6 = vadd.f32 %v773_v5, %v516_v0  ;;  %v775_v7 = vpop.f32.mrb[1].mxu1 }
 0x1dd   : > { %v1661_v8 = vadd.f32 %v775_v7, %v518_v1  ;;  %v1013_v7 = vpop.permute.xlu1 %1012 }
 0x1de   : > { %v786_v9 = vadd.f32 %v1660_v6, %v2049_v26 }
 0x1df   : > { %v787_v10 = vadd.f32 %v1661_v8, %v2049_v26  ;;  %v1126_v26 = vcombine.low %v1122_v25, %v1122_v25 }
 0x1e1   : > { %v794_v11 = vcombine.low %v786_v9, %v787_v10  ;;  %v1071_v16 = vpop.permute.xlu1 %1070 }
 0x1e3   : > { %795 = vrot.lane.b32.xlu0 %v794_v11, %s1704_s11 }
 0x1e5   : > { %v1130_v22 = vpop.permute.xlu1 %1129 }
 0x1e7   : > { %892 = vrot.lane.b32.xlu0 %v890_v13, %s1712_s23 }
 0x1eb   : > { %955 = vrot.lane.b32.xlu0 %v950_v15, %s1713_s24 }
 0x1ef   : > { %1014 = vrot.lane.b32.xlu0 %v1009_v17, %s1714_s26 }
 0x1f3   : > { %951 = vrot.lane.b32.xlu0 %v949_v19, %s1713_s24 }
 0x1f7   : > { %1010 = vrot.lane.b32.xlu0 %v1008_v21, %s1714_s26 }
 0x1fb   : > { %1072 = vrot.lane.b32.xlu0 %v1067_v24, %s1715_s29 }
 0x1ff   : > { %1131 = vrot.lane.b32.xlu0 %v1126_v26, %s1716_s30 }
 0x203   : > { %1068 = vrot.lane.b32.xlu0 %v1066_v27, %s1715_s29 }
 0x207   : > { %1127 = vrot.lane.b32.xlu0 %v1125_v33, %s1716_s30 }
 0x20b   : > { %1190 = vrot.lane.b32.xlu0 %v1185_v37, %s1717_s9 }
 0x20f   : > { %1249 = vrot.lane.b32.xlu0 %v1244_v42, %s1718_s10 }
 0x213   : > { %1186 = vrot.lane.b32.xlu0 %v1184_v45, %s1717_s9 }
 0x217   : > { %1245 = vrot.lane.b32.xlu0 %v1243_v49, %s1718_s10 }
 0x21b   : > { %1308 = vrot.lane.b32.xlu0 %v1303_v53, %s1719_s12 }
 0x255   : > { %v796_v60 = vpop.permute.xlu0 %795 }
 0x256   : > { %v797_v62 = vrot.slane %v796_v60, 4 }
 0x258   : > { %v799_v63 = vsel %vm798_vm7, %v797_v62, %v796_v60  ;;  %806 = vst.msk [vmem:[#allocation3 + $0x8] sm:$0xf] %vm788_vm2, %v797_v62  ;;  %vm1053_vm2 = vcmask 908288   ;;  %vm1289_vm7 = vcmask 769024  }
 0x259   : > { %805 = vst.msk [vmem:[#allocation3] sm:$0xff] %vm2038_vm8, %v799_v63  ;;  %v893_v55 = vpop.permute.xlu0 %892  ;;  %vm1341_vm8 = vcmask 588800  }
 0x25a   : > { %v898_v0 = vsel %vm877_vm0, %v893_v55, %v895_v2 }
 0x25b   : > { %902 = vst [vmem:[#allocation4 + $0x10] sm:$0xf0] %v898_v0 }
 0x25d   : > { %v956_v1 = vpop.permute.xlu0 %955 }
 0x25e   : > { %v958_v3 = vsel %vm936_vm1, %v954_v58, %v956_v1 }
 0x25f   : > { %962 = vst [vmem:[#allocation4 + $0x28] sm:$0xf0] %v958_v3  ;;  %v848_v4 = vld [vmem:[#allocation3 + $0x8] sm:$0xf] }
 0x260   : > { %v2179_v5 = vld [vmem:[#allocation3] sm:$0xff]  ;;  %v867_v6 = vmul.f32 %v2051_v28, %v848_v4  ;;  %v907_v9 = vld [vmem:[#allocation3 + $0x8] sm:$0xf] }
 0x261   : > { %v832_v18 = vmul.f32 %v1937_v31, %v2179_v5  ;;  %v1015_v8 = vpop.permute.xlu0 %1014  ;;  %v2186_v2 = vmul.f32 %v2054_v30, %v2179_v5  ;;  %v926_v28 = vmul.f32 %v2056_v32, %v907_v9  ;;  %v2195_v31 = vmul.f32 %v2062_v34, %v2179_v5  ;;  %v966_v12 = vld [vmem:[#allocation3 + $0x8] sm:$0xf] }
 0x262   : > { %v1017_v10 = vsel %vm995_vm3, %v1013_v7, %v1015_v8  ;;  %875 = vrot.lane.b32.xlu0 %v867_v6, %s1712_s23  ;;  %v985_v54 = vmul.f32 %v2069_v38, %v966_v12  ;;  %v2204_v32 = vmul.f32 %v2074_v40, %v2179_v5  ;;  %v1025_v34 = vld [vmem:[#allocation3 + $0x8] sm:$0xf]  ;;  %v1042_v19 = vmul.f32 %v2083_v43, %v2179_v5 }
 0x263   : > { %836 = vst [vmem:[#allocation4] sm:$0xf] %v832_v18  ;;  %1021 = vst [vmem:[#allocation4 + $0x38] sm:$0xf0] %v1017_v10  ;;  %871 = vrot.lane.b32.xlu1 %v2186_v2, %s1712_s23  ;;  %v834_v13 = vcombine.high %v832_v18, %v832_v18  ;;  %v1043_v17 = vmul.f32 %v2071_v39, %v1025_v34  ;;  %v1083_v20 = vld [vmem:[#allocation3 + $0x8] sm:$0xf]  ;;  %v1101_v39 = vmul.f32 %v2093_v47, %v2179_v5 }
 0x264   : > { %v1102_v21 = vmul.f32 %v2085_v44, %v1083_v20  ;;  %v1142_v24 = vld [vmem:[#allocation3 + $0x8] sm:$0xf]  ;;  %v1160_v27 = vmul.f32 %v2103_v51, %v2179_v5  ;;  %v1219_v35 = vmul.f32 %v2113_v56, %v2179_v5  ;;  %v1189_v51 = vpop.permute.xlu1 %1188  ;;  %v1302_v56 = vcombine.low %v2128_v61, %v2128_v61  ;;  %v1335_v18 = vld [vmem:[%s2300_s5] sm:$0xf] }
 0x265   : > { %v952_v11 = vpop.permute.xlu0 %951  ;;  %837 = vst [vmem:[#allocation4 + $0x8] sm:$0xf] %v834_v13  ;;  %v1161_v43 = vmul.f32 %v2095_v48, %v1142_v24  ;;  %v1201_v44 = vld [vmem:[#allocation3 + $0x8] sm:$0xf]  ;;  %v988_v53 = vcombine.high %v2204_v32, %v2204_v32  ;;  %v1046_v62 = vcombine.high %v1042_v19, %v1042_v19  ;;  %v1278_v6 = vmul.f32 %v2123_v59, %v2179_v5 }
 0x266   : > { %v957_v30 = vsel %vm936_vm1, %v952_v11, %v954_v58  ;;  %934 = vrot.lane.b32.xlu0 %v926_v28, %s1713_s24  ;;  %v1220_v47 = vmul.f32 %v2105_v52, %v1201_v44  ;;  %v1260_v36 = vld [vmem:[#allocation3 + $0x8] sm:$0xf]  ;;  %v870_v52 = vcombine.high %v2186_v2, %v2186_v2  ;;  %v1105_v58 = vcombine.high %v1101_v39, %v1101_v39 }
 0x267   : > { %961 = vst [vmem:[#allocation4 + $0x20] sm:$0xf0] %v957_v30  ;;  %930 = vrot.lane.b32.xlu1 %v2195_v31, %s1713_s24  ;;  %v1279_v37 = vmul.f32 %v2115_v57, %v1260_v36  ;;  %v929_v57 = vcombine.high %v2195_v31, %v2195_v31  ;;  %v1164_v3 = vcombine.high %v1160_v27, %v1160_v27 }
 0x268   : > { %v1248_v45 = vpop.permute.xlu1 %1247  ;;  %v1223_v4 = vcombine.high %v1219_v35, %v1219_v35 }
 0x269   : > { %v1011_v14 = vpop.permute.xlu0 %1010 }
 0x26a   : > { %v1016_v15 = vsel %vm995_vm3, %v1011_v14, %v1013_v7  ;;  %993 = vrot.lane.b32.xlu0 %v985_v54, %s1714_s26  ;;  %v1282_v7 = vcombine.high %v1278_v6, %v1278_v6 }
 0x26b   : > { %1020 = vst [vmem:[#allocation4 + $0x30] sm:$0xf0] %v1016_v15  ;;  %989 = vrot.lane.b32.xlu1 %v2204_v32, %s1714_s26 }
 0x26c   : > { %v1307_v55 = vpop.permute.xlu1 %1306  ;;  %v1318_v24 = vld [vmem:[#allocation4 + $0x8] sm:$0xff] }
 0x26d   : > { %v1073_v38 = vpop.permute.xlu0 %1072 }
 0x26e   : > { %v1075_v40 = vsel %vm1053_vm2, %v1071_v16, %v1073_v38  ;;  %1051 = vrot.lane.b32.xlu0 %v1043_v17, %s1715_s29 }
 0x26f   : > { %1079 = vst [vmem:[#allocation4 + $0x48] sm:$0xf0] %v1075_v40  ;;  %1047 = vrot.lane.b32.xlu1 %v1042_v19, %s1715_s29 }
 0x271   : > { %v1132_v23 = vpop.permute.xlu0 %1131 }
 0x272   : > { %v1134_v25 = vsel %vm1112_vm4, %v1130_v22, %v1132_v23  ;;  %1110 = vrot.lane.b32.xlu0 %v1102_v21, %s1716_s30 }
 0x273   : > { %1138 = vst [vmem:[#allocation4 + $0x58] sm:$0xf0] %v1134_v25  ;;  %1106 = vrot.lane.b32.xlu1 %v1101_v39, %s1716_s30 }
 0x275   : > { %v1069_v26 = vpop.permute.xlu0 %1068 }
 0x276   : > { %v1074_v29 = vsel %vm1053_vm2, %v1069_v26, %v1071_v16  ;;  %1169 = vrot.lane.b32.xlu0 %v1161_v43, %s1717_s9 }
 0x277   : > { %1078 = vst [vmem:[#allocation4 + $0x40] sm:$0xf0] %v1074_v29  ;;  %1165 = vrot.lane.b32.xlu1 %v1160_v27, %s1717_s9 }
 0x279   : > { %v1128_v33 = vpop.permute.xlu0 %1127 }
 0x27a   : > { %v1133_v48 = vsel %vm1112_vm4, %v1128_v33, %v1130_v22  ;;  %1228 = vrot.lane.b32.xlu0 %v1220_v47, %s1718_s10  ;;  %v1317_v22 = vld [vmem:[#allocation4] sm:$0xff] }
 0x27b   : > { %1137 = vst [vmem:[#allocation4 + $0x50] sm:$0xf0] %v1133_v48  ;;  %1224 = vrot.lane.b32.xlu1 %v1219_v35, %s1718_s10 }
 0x27d   : > { %v1191_v41 = vpop.permute.xlu0 %1190 }
 0x27e   : > { %v1193_v42 = vsel %vm1171_vm5, %v1189_v51, %v1191_v41  ;;  %1287 = vrot.lane.b32.xlu0 %v1279_v37, %s1719_s12 }
 0x27f   : > { %1197 = vst [vmem:[#allocation4 + $0x68] sm:$0xf0] %v1193_v42  ;;  %873 = vrot.lane.b32.xlu1 %v870_v52, %s1712_s23 }
 0x281   : > { %v1250_v46 = vpop.permute.xlu0 %1249 }
 0x282   : > { %v1252_v49 = vsel %vm1230_vm6, %v1248_v45, %v1250_v46  ;;  %1304 = vrot.lane.b32.xlu0 %v1302_v56, %s1719_s12 }
 0x283   : > { %1256 = vst [vmem:[#allocation4 + $0x78] sm:$0xf0] %v1252_v49  ;;  %932 = vrot.lane.b32.xlu1 %v929_v57, %s1713_s24 }
 0x285   : > { %v1187_v50 = vpop.permute.xlu0 %1186 }
 0x286   : > { %v1192_v60 = vsel %vm1171_vm5, %v1187_v50, %v1189_v51 }
 0x287   : > { %1196 = vst [vmem:[#allocation4 + $0x60] sm:$0xf0] %v1192_v60  ;;  %991 = vrot.lane.b32.xlu1 %v988_v53, %s1714_s26 }
 0x289   : > { %v1246_v61 = vpop.permute.xlu0 %1245 }
 0x28a   : > { %v1251_v63 = vsel %vm1230_vm6, %v1246_v61, %v1248_v45 }
 0x28b   : > { %1255 = vst [vmem:[#allocation4 + $0x70] sm:$0xf0] %v1251_v63  ;;  %1049 = vrot.lane.b32.xlu1 %v1046_v62, %s1715_s29 }
 0x28d   : > { %v1309_v0 = vpop.permute.xlu0 %1308 }
 0x28e   : > { %v1311_v1 = vsel %vm1289_vm7, %v1307_v55, %v1309_v0 }
 0x28f   : > { %1315 = vst [vmem:[#allocation4 + $0x88] sm:$0xf0] %v1311_v1  ;;  %1108 = vrot.lane.b32.xlu1 %v1105_v58, %s1716_s30 }
 0x293   : > { %1167 = vrot.lane.b32.xlu1 %v1164_v3, %s1717_s9 }
 0x297   : > { %1226 = vrot.lane.b32.xlu1 %v1223_v4, %s1718_s10 }
 0x29b   : > { %1285 = vrot.lane.b32.xlu1 %v1282_v7, %s1719_s12 }
 0x29f   : > { %1283 = vrot.lane.b32.xlu1 %v1278_v6, %s1719_s12 }
 0x2a3   : > { %1338 = vperm.xlu1 %1693, %v1335_v18  }
 0x2d4   : > { %v876_v8 = vpop.permute.xlu0 %875 }
 0x2d5   : > { %v872_v2 = vpop.permute.xlu1 %871 }
 0x2d8   : > { %v935_v9 = vpop.permute.xlu0 %934 }
 0x2d9   : > { %v931_v10 = vpop.permute.xlu1 %930 }
 0x2dc   : > { %v994_v28 = vpop.permute.xlu0 %993 }
 0x2dd   : > { %v990_v11 = vpop.permute.xlu1 %989 }
 0x2e0   : > { %v1052_v31 = vpop.permute.xlu0 %1051 }
 0x2e1   : > { %v1048_v59 = vpop.permute.xlu1 %1047 }
 0x2e4   : > { %v1111_v5 = vpop.permute.xlu0 %1110 }
 0x2e5   : > { %v1107_v12 = vpop.permute.xlu1 %1106 }
 0x2e8   : > { %v1170_v30 = vpop.permute.xlu0 %1169 }
 0x2e9   : > { %v1166_v13 = vpop.permute.xlu1 %1165 }
 0x2ec   : > { %v1229_v54 = vpop.permute.xlu0 %1228 }
 0x2ed   : > { %v1225_v14 = vpop.permute.xlu1 %1224 }
 0x2f0   : > { %v2264_v32 = vpop.permute.xlu0 %1287 }
 0x2f1   : > { %v874_v34 = vpop.permute.xlu1 %873 }
 0x2f2   : > { %v878_v15 = vsel %vm877_vm0, %v872_v2, %v874_v34  ;;  %v879_v16 = vsel %vm877_vm0, %v874_v34, %v876_v8 }
 0x2f3   : > { %882 = vst [vmem:[#allocation4 + $0x10] sm:$0xf] %v878_v15  ;;  %883 = vst [vmem:[#allocation4 + $0x18] sm:$0xf] %v879_v16 }
 0x2f4   : > { %v1305_v17 = vpop.permute.xlu0 %1304 }
 0x2f5   : > { %v1310_v38 = vsel %vm1289_vm7, %v1305_v17, %v1307_v55  ;;  %v933_v19 = vpop.permute.xlu1 %932 }
 0x2f6   : > { %1314 = vst [vmem:[#allocation4 + $0x80] sm:$0xf0] %v1310_v38  ;;  %v937_v20 = vsel %vm936_vm1, %v931_v10, %v933_v19  ;;  %v938_v40 = vsel %vm936_vm1, %v933_v19, %v935_v9  ;;  %v1316_v10 = vld [vmem:[%s2299_s4] sm:$0xf] }
 0x2f7   : > { %941 = vst [vmem:[#allocation4 + $0x20] sm:$0xf] %v937_v20  ;;  %942 = vst [vmem:[#allocation4 + $0x28] sm:$0xf] %v938_v40 }
 0x2f9   : > { %v992_v21 = vpop.permute.xlu1 %991 }
 0x2fa   : > { %v996_v23 = vsel %vm995_vm3, %v990_v11, %v992_v21  ;;  %v997_v39 = vsel %vm995_vm3, %v992_v21, %v994_v28  ;;  %v1320_v25 = vld [vmem:[#allocation4 + $0x18] sm:$0xff]  ;;  %v1319_v43 = vld [vmem:[#allocation4 + $0x10] sm:$0xff] }
 0x2fb   : > { %1000 = vst [vmem:[#allocation4 + $0x30] sm:$0xf] %v996_v23  ;;  %1001 = vst [vmem:[#allocation4 + $0x38] sm:$0xf] %v997_v39  ;;  %v1644_v26 = vpack.c.bf16 %v1320_v25, %v1318_v24  ;;  %v1646_v27 = vpack.c.bf16 %v1319_v43, %v1317_v22 }
 0x2fd   : > { %v1050_v44 = vpop.permute.xlu1 %1049  ;;  %1645 = vmatprep.subr.bf16.mxu0 %v1644_v26 }
 0x2fe   : > { %v1054_v29 = vsel %vm1053_vm2, %v1048_v59, %v1050_v44  ;;  %v1055_v47 = vsel %vm1053_vm2, %v1050_v44, %v1052_v31  ;;  %1647 = vmatpush1.bf16.msra.mxu0 %v1646_v27  ;;  %v1322_v35 = vld [vmem:[#allocation4 + $0x28] sm:$0xff]  ;;  %v1321_v37 = vld [vmem:[#allocation4 + $0x20] sm:$0xff] }
 0x2ff   : > { %1058 = vst [vmem:[#allocation4 + $0x40] sm:$0xf] %v1054_v29  ;;  %1059 = vst [vmem:[#allocation4 + $0x48] sm:$0xf] %v1055_v47 }
 0x301   : > { %v1109_v33 = vpop.permute.xlu1 %1108 }
 0x302   : > { %v1113_v36 = vsel %vm1112_vm4, %v1107_v12, %v1109_v33  ;;  %v1114_v48 = vsel %vm1112_vm4, %v1109_v33, %v1111_v5  ;;  %v1324_v51 = vld [vmem:[#allocation4 + $0x38] sm:$0xff]  ;;  %v1323_v41 = vld [vmem:[#allocation4 + $0x30] sm:$0xff] }
 0x303   : > { %1117 = vst [vmem:[#allocation4 + $0x50] sm:$0xf] %v1113_v36  ;;  %1118 = vst [vmem:[#allocation4 + $0x58] sm:$0xf] %v1114_v48  ;;  %v1648_v52 = vpack.c.bf16 %v1324_v51, %v1322_v35  ;;  %v1650_v42 = vpack.c.bf16 %v1323_v41, %v1321_v37 }
 0x305   : > { %v1168_v56 = vpop.permute.xlu1 %1167  ;;  %1649 = vmatprep.subr.bf16.mxu0 %v1648_v52 }
 0x306   : > { %v1172_v45 = vsel %vm1171_vm5, %v1166_v13, %v1168_v56  ;;  %v1173_v46 = vsel %vm1171_vm5, %v1168_v56, %v1170_v30  ;;  %1651 = vmatpush1.bf16.msra.mxu0 %v1650_v42  ;;  %v1326_v49 = vld [vmem:[#allocation4 + $0x48] sm:$0xff]  ;;  %v1325_v61 = vld [vmem:[#allocation4 + $0x40] sm:$0xff] }
 0x307   : > { %1176 = vst [vmem:[#allocation4 + $0x60] sm:$0xf] %v1172_v45  ;;  %1177 = vst [vmem:[#allocation4 + $0x68] sm:$0xf] %v1173_v46 }
 0x309   : > { %v1227_v57 = vpop.permute.xlu1 %1226 }
 0x30a   : > { %v1231_v50 = vsel %vm1230_vm6, %v1225_v14, %v1227_v57  ;;  %v1232_v53 = vsel %vm1230_vm6, %v1227_v57, %v1229_v54  ;;  %v1328_v60 = vld [vmem:[#allocation4 + $0x58] sm:$0xff]  ;;  %v1327_v62 = vld [vmem:[#allocation4 + $0x50] sm:$0xff] }
 0x30b   : > { %1235 = vst [vmem:[#allocation4 + $0x70] sm:$0xf] %v1231_v50  ;;  %1236 = vst [vmem:[#allocation4 + $0x78] sm:$0xf] %v1232_v53  ;;  %v1652_v63 = vpack.c.bf16 %v1328_v60, %v1326_v49  ;;  %v1654_v55 = vpack.c.bf16 %v1327_v62, %v1325_v61 }
 0x30d   : > { %v1286_v0 = vpop.permute.xlu1 %1285  ;;  %1653 = vmatprep.subr.bf16.mxu0 %v1652_v63 }
 0x30e   : > { %v1291_v58 = vsel %vm1289_vm7, %v1286_v0, %v2264_v32  ;;  %1655 = vmatpush1.bf16.msra.mxu0 %v1654_v55  ;;  %v1330_v3 = vld [vmem:[#allocation4 + $0x68] sm:$0xff]  ;;  %v1329_v7 = vld [vmem:[#allocation4 + $0x60] sm:$0xff] }
 0x30f   : > { %1295 = vst [vmem:[#allocation4 + $0x88] sm:$0xf] %v1291_v58 }
 0x311   : > { %v1284_v1 = vpop.permute.xlu1 %1283 }
 0x312   : > { %v1290_v4 = vsel %vm1289_vm7, %v1284_v1, %v1286_v0  ;;  %v1332_v6 = vld [vmem:[#allocation4 + $0x78] sm:$0xff]  ;;  %v1331_v18 = vld [vmem:[#allocation4 + $0x70] sm:$0xff] }
 0x313   : > { %1294 = vst [vmem:[#allocation4 + $0x80] sm:$0xf] %v1290_v4  ;;  %v1656_v8 = vpack.c.bf16 %v1332_v6, %v1330_v3  ;;  %v1658_v2 = vpack.c.bf16 %v1331_v18, %v1329_v7 }
 0x315   : > { %1657 = vmatprep.subr.bf16.mxu0 %v1656_v8 }
 0x316   : > { %1659 = vmatpush1.bf16.msra.mxu0 %v1658_v2  ;;  %v1334_v9 = vld [vmem:[#allocation4 + $0x88] sm:$0xff] }
 0x317   : > { %1361 = vmatprep.subr.mxu0 %v1334_v9 }
 0x31a   : > { %v1333_v28 = vld [vmem:[#allocation4 + $0x80] sm:$0xff] }
 0x31b   : > { %1362 = vmatpush1.msra.mxu0 %v1333_v28 }
 0x31c   : > { %1567 = vmatmul.mubr.msk.f32.vlgmr.msra.gmra.mrb[4].mxu0 %vm1341_vm8, %v1316_v10 }
 0x322   : > { %v1339_v11 = vpop.permute.xlu1 %1338 }
 0x3ef   : > { %v1411_v31 = vpop.f32.mrb[4].mxu0 }
 0x3f0   : > { %v1412_v59 = vadd.f32 %v1411_v31, %v1339_v11  ;;  %v1413_v5 = vpop.f32.mrb[5].mxu0 }
 0x3f1   : > { %v1414_v12 = vadd.f32 %v1413_v5, %v1339_v11 }
 0x3f2   : > { %vm1416_vm9 = vcmp.gt.f32.partialorder %v1412_v59, 0.0  ;;  %v1418_v30 = vmul.f32 0.01, %v1412_v59 }
 0x3f3   : > { %vm1417_vm10 = vcmp.gt.f32.partialorder %v1414_v12, 0.0  ;;  %v1419_v13 = vmul.f32 0.01, %v1414_v12 }
 0x3f4   : > { %v1420_v54 = vsel %vm1416_vm9, %v1412_v59, %v1418_v30 }
 0x3f5   : > { %v1421_v14 = vsel %vm1417_vm10, %v1414_v12, %v1419_v13 }
 0x3f6   : > { %v1424_v32 = vcombine.low %v1420_v54, %v1421_v14 }
 0x3f8   : > { %1426 = vst [vmem:[%s322_s18] sm:$0xff] %v1424_v32 }
 0x3f9 PF: > { %s18_s27 = sadd.s32 1, %s1700_s27  }
 0x3fa   : > { %p15_p4 = scmp.ge.s32.totalorder %s18_s27, 4  }
 0x3fc   :  { %17 = sbr.rel (!%p15_p4) target bundleno = 1 (0x1), region = 96 }

</bundles_post_ra>
